<compile_context>
chip_gen: v7x
topology: tpu7x:2x2x1
jax: 0.10.0
libtpu: 0.0.40
codegen_flags: <defaults>
</compile_context>

<pallas_src>
import numpy as np

import jax
import jax.numpy as jnp
from jax import lax
from jax.experimental import pallas as pl
from jax.experimental.pallas import tpu as pltpu


# ---------------------------------------------------------------------------
# Kernels
# ---------------------------------------------------------------------------
def _upsample_conv_kernel(x_ref, mcol_ref, arow_ref, bias_ref, o_ref):
    """Fused nearest-2x upsample + 3x3 conv; one batch block per grid step.

    x_ref    : (Bb, C_in, H, W)            input tile (VMEM)
    mcol_ref : (4, C_out, C_in, W, 2W)     weight-embedded banded column matrices
    arow_ref : (4, 2H, H)                  structural row shift/interleave matrices
    bias_ref : (C_out,)                    bias (SMEM scalars)
    o_ref    : (Bb, C_out, 2H, 2W)         final interleaved output tile (VMEM)
    """
    Bb, C_in, H, W = x_ref.shape
    C_out, TH, TW = o_ref.shape[1], o_ref.shape[2], o_ref.shape[3]
    f32 = jnp.float32

    # Hoist the four (2H, H) structural row matrices (shared by everything below).
    arows = [arow_ref[j] for j in range(4)]

    for bi in range(Bb):
        accs = [jnp.zeros((TH, TW), f32) for _ in range(C_out)]
        for c in range(C_in):
            xc = x_ref[bi, c]                               # (H, W)
            for j in range(4):
                # Row stage: shift + row-parity interleave (0/1 matrix on the MXU).
                # Computed once per (c, j) and reused for every output channel.
                xrj = jnp.dot(arows[j], xc, preferred_element_type=f32)   # (2H, W)
                for o in range(C_out):
                    # Column stage: collapsed column taps + column-parity interleave
                    # with the conv weights folded into the banded matrix.
                    accs[o] = accs[o] + jnp.dot(
                        xrj, mcol_ref[j, o, c], preferred_element_type=f32)
        for o in range(C_out):
            o_ref[bi, o] = (accs[o] + bias_ref[o]).astype(o_ref.dtype)


def _upsample_nearest_kernel(x_ref, ur_ref, uc_ref, o_ref):
    """Nearest-2x upsample written directly in the final interleaved layout.

    x_ref: (Bb, C, H, W); ur_ref: (2H, H); uc_ref: (W, 2W); o_ref: (Bb, C, 2H, 2W).
    """
    Bb, C, H, W = x_ref.shape
    ur = ur_ref[...]
    uc = uc_ref[...]
    for bi in range(Bb):
        for c in range(C):
            t = jnp.dot(ur, x_ref[bi, c], preferred_element_type=jnp.float32)
            o_ref[bi, c] = jnp.dot(
                t, uc, preferred_element_type=jnp.float32).astype(o_ref.dtype)


# ---------------------------------------------------------------------------
# Wrapper helpers (weight / structural-matrix preprocessing; all tiny)
# ---------------------------------------------------------------------------
def _collapsed_weights(w):
    """OIHW (C_out, C_in, 3, 3) -> collapsed weights Wc[p, q, a, b, o, c].

    For output row parity p the three conv row taps land on only two source rows of
    the pre-upsample image (duplicated rows share a pre-summed weight); same for
    columns.  R[p, t, k] sums original tap k into collapsed tap t for parity p.
    Collapsed tap offsets are delta = p + t - 1 (rows) / q + t - 1 (cols).
    """
    R = jnp.array([[[1., 0., 0.], [0., 1., 1.]],
                   [[1., 1., 0.], [0., 0., 1.]]], dtype=w.dtype)   # (parity, tap, k)
    return jnp.einsum('pak,qbl,ockl->pqaboc', R, R, w)             # (2,2,2,2,Co,Ci)


def _col_structure(W):
    """S[q, b, w_src, 2*w+q] = 1 iff w_src == w + (q + b - 1) and 0 <= w_src < W."""
    S = np.zeros((2, 2, W, 2 * W), np.float32)
    for q in range(2):
        for b in range(2):
            dc = q + b - 1
            for w in range(W):
                ws = w + dc
                if 0 <= ws < W:
                    S[q, b, ws, 2 * w + q] = 1.0
    return S


def _row_structure(H):
    """A[p*2+a, 2*h+p, h_src] = 1 iff h_src == h + (p + a - 1) and 0 <= h_src < H."""
    A = np.zeros((2, 2, 2 * H, H), np.float32)
    for p in range(2):
        for a in range(2):
            dr = p + a - 1
            for h in range(H):
                hs = h + dr
                if 0 <= hs < H:
                    A[p, a, 2 * h + p, hs] = 1.0
    return A.reshape(4, 2 * H, H)


def _upsample_structure(H, W):
    """0/1 nearest-upsample matrices: Ur (2H, H), Uc (W, 2W)."""
    Ur = np.zeros((2 * H, H), np.float32)
    Ur[np.arange(2 * H), np.arange(2 * H) // 2] = 1.0
    Uc = np.zeros((W, 2 * W), np.float32)
    Uc[np.arange(2 * W) // 2, np.arange(2 * W)] = 1.0
    return Ur, Uc


def _build_mcol(w, W):
    """Banded column matrices Mcol[j, o, c] : (W, 2W), j = row_parity*2 + row_tap.

    Mcol[p,a,o,c][w_src, 2*w+q] = sum_b Wc[p,q,a,b,o,c] * [w_src == w + (q+b-1)],
    i.e. collapsed column taps + column-parity interleave + weights, with the zero
    image-boundary columns dropped structurally.
    """
    C_out, C_in = w.shape[0], w.shape[1]
    Wc = _collapsed_weights(w)                                  # (2,2,2,2,Co,Ci)
    S = jnp.asarray(_col_structure(W), dtype=w.dtype)           # (2,2,W,2W)
    m = jnp.einsum('pqaboc,qbws->paocws', Wc, S)                 # (2,2,Co,Ci,W,2W)
    return m.reshape(4, C_out, C_in, W, 2 * W)


def _pick_batch_block(B):
    """Pack images per grid step, but keep >= 2 'parallel' steps when B >= 2
    (v7x megacore) so the second TensorCore never idles."""
    for bb in (8, 4, 2):
        if B % bb == 0 and B // bb >= 2:
            return bb
    return 1


# ---------------------------------------------------------------------------
# Forward pass
# ---------------------------------------------------------------------------
def upsample_forward(x, weight=None, bias=None, *, with_conv=True):
    """Forward pass of the PyTorch Upsample module.  x: (B, C, H, W)."""
    B, C, H, W = x.shape
    TH, TW = 2 * H, 2 * W
    Bb = _pick_batch_block(B)
    grid = (B // Bb,)
    # TODO(synk): for large H add a row-band grid axis (1-row halo) to bound VMEM.
    cparams = pltpu.CompilerParams(
        dimension_semantics=("parallel",),
        vmem_limit_bytes=32 * 1024 * 1024,
    )

    if not with_conv:
        Ur, Uc = _upsample_structure(H, W)
        return pl.pallas_call(
            _upsample_nearest_kernel,
            out_shape=jax.ShapeDtypeStruct((B, C, TH, TW), x.dtype),
            grid_spec=pltpu.PrefetchScalarGridSpec(
                num_scalar_prefetch=0,
                grid=grid,
                in_specs=[
                    pl.BlockSpec((Bb, C, H, W), lambda i: (i, 0, 0, 0)),
                    pl.BlockSpec((TH, H), lambda i: (0, 0)),
                    pl.BlockSpec((W, TW), lambda i: (0, 0)),
                ],
                out_specs=pl.BlockSpec((Bb, C, TH, TW), lambda i: (i, 0, 0, 0)),
            ),
            compiler_params=cparams,
        )(x, jnp.asarray(Ur, x.dtype), jnp.asarray(Uc, x.dtype))

    C_out = weight.shape[0]
    mcol = _build_mcol(weight.astype(x.dtype), W)            # (4, Co, Ci, W, 2W)
    arow = jnp.asarray(_row_structure(H), x.dtype)           # (4, 2H, H)
    bias_smem = bias.astype(jnp.float32)                     # SMEM scalars are 32-bit

    return pl.pallas_call(
        _upsample_conv_kernel,
        out_shape=jax.ShapeDtypeStruct((B, C_out, TH, TW), x.dtype),
        grid_spec=pltpu.PrefetchScalarGridSpec(
            num_scalar_prefetch=0,
            grid=grid,
            in_specs=[
                pl.BlockSpec((Bb, C, H, W), lambda i: (i, 0, 0, 0)),
                pl.BlockSpec((4, C_out, C, W, TW), lambda i: (0, 0, 0, 0, 0)),
                pl.BlockSpec((4, TH, H), lambda i: (0, 0, 0)),
                pl.BlockSpec(memory_space=pltpu.MemorySpace.SMEM),
            ],
            out_specs=pl.BlockSpec((Bb, C_out, TH, TW), lambda i: (i, 0, 0, 0)),
        ),
        compiler_params=cparams,
    )(x, mcol, arow, bias_smem)


# ---------------------------------------------------------------------------
# Pure-JAX reference mirroring the PyTorch module
# ---------------------------------------------------------------------------
def upsample_ref(x, weight=None, bias=None, *, with_conv=True):
    u = jnp.repeat(jnp.repeat(x, 2, axis=2), 2, axis=3)        # nearest, scale 2
    if with_conv:
        u = lax.conv_general_dilated(
            u, weight, window_strides=(1, 1), padding=((1, 1), (1, 1)),
            dimension_numbers=('NCHW', 'OIHW', 'NCHW'),
            precision=lax.Precision.HIGHEST)
        u = u + bias.reshape(1, -1, 1, 1)
    return u


if __name__ == "__main__":
    in_channels = 3                    # from the module spec
    B, C, H, W = 2, in_channels, 16, 16

    key = jax.random.PRNGKey(0)
    kx, kw, kb = jax.random.split(key, 3)
    x = jax.random.normal(kx, (B, C, H, W), dtype=jnp.float32)
    w = 0.1 * jax.random.normal(kw, (C, C, 3, 3), dtype=jnp.float32)  # Conv2d OIHW
    b = 0.1 * jax.random.normal(kb, (C,), dtype=jnp.float32)          # Conv2d bias

    # with_conv=True path.  Tolerance allows for the MXU's default (reduced-
    # precision) f32 matmul passes; typical error is far below this.
    y = jax.block_until_ready(upsample_forward(x, w, b, with_conv=True))
    y_ref = upsample_ref(x, w, b, with_conv=True)
    assert y.shape == (B, C, 2 * H, 2 * W)
    assert jnp.allclose(y, y_ref, atol=1e-2, rtol=1e-2), (
        "with_conv=True mismatch: max err %e"
        % float(jnp.max(jnp.abs(y - y_ref))))

    # with_conv=False path
    y2 = jax.block_until_ready(upsample_forward(x, with_conv=False))
    y2_ref = upsample_ref(x, with_conv=False)
    assert y2.shape == (B, C, 2 * H, 2 * W)
    assert jnp.allclose(y2, y2_ref, atol=1e-2, rtol=1e-2), (
        "with_conv=False mismatch: max err %e"
        % float(jnp.max(jnp.abs(y2 - y2_ref))))

    print("KERNEL_OK")
</pallas_src>

<mosaic_0001>
module attributes {stable_mosaic.version = 11 : i64} {
  func.func @_upsample_conv_kernel(%arg0: i32, %arg1: memref<1x3x16x16xf32, #tpu.memory_space<vmem>>, %arg2: memref<4x3x3x16x32xf32, #tpu.memory_space<vmem>>, %arg3: memref<4x32x16xf32, #tpu.memory_space<vmem>>, %arg4: memref<3xf32, #tpu.memory_space<smem>>, %arg5: memref<1x3x32x32xf32, #tpu.memory_space<vmem>>) attributes {dimension_semantics = [#tpu.dimension_semantics<parallel>], iteration_bounds = array<i64: 2>, scalar_prefetch = 0 : i64, scratch_operands = 0 : i64, tpu.core_type = #tpu.core_type<tc>, window_params = [{transform_indices = @transform_0, window_bounds = array<i64: 1, 3, 16, 16>}, {pipeline_mode = #tpu.pipeline_mode<synchronous>, transform_indices = @transform_1, window_bounds = array<i64: 4, 3, 3, 16, 32>}, {pipeline_mode = #tpu.pipeline_mode<synchronous>, transform_indices = @transform_2, window_bounds = array<i64: 4, 32, 16>}, {transform_indices = @transform_3, window_bounds = array<i64: 3>}, {transform_indices = @transform_4, window_bounds = array<i64: 1, 3, 32, 32>}]} {
    %c0 = arith.constant 0 : index
    %c0_0 = arith.constant 0 : index
    %c0_1 = arith.constant 0 : index
    %0 = vector.load %arg3[%c0, %c0_0, %c0_1] : memref<4x32x16xf32, #tpu.memory_space<vmem>>, vector<1x32x16xf32>
    %1 = vector.shape_cast %0 : vector<1x32x16xf32> to vector<32x16xf32>
    %c1 = arith.constant 1 : index
    %c0_2 = arith.constant 0 : index
    %c0_3 = arith.constant 0 : index
    %2 = vector.load %arg3[%c1, %c0_2, %c0_3] : memref<4x32x16xf32, #tpu.memory_space<vmem>>, vector<1x32x16xf32>
    %3 = vector.shape_cast %2 : vector<1x32x16xf32> to vector<32x16xf32>
    %c2 = arith.constant 2 : index
    %c0_4 = arith.constant 0 : index
    %c0_5 = arith.constant 0 : index
    %4 = vector.load %arg3[%c2, %c0_4, %c0_5] : memref<4x32x16xf32, #tpu.memory_space<vmem>>, vector<1x32x16xf32>
    %5 = vector.shape_cast %4 : vector<1x32x16xf32> to vector<32x16xf32>
    %c3 = arith.constant 3 : index
    %c0_6 = arith.constant 0 : index
    %c0_7 = arith.constant 0 : index
    %6 = vector.load %arg3[%c3, %c0_6, %c0_7] : memref<4x32x16xf32, #tpu.memory_space<vmem>>, vector<1x32x16xf32>
    %7 = vector.shape_cast %6 : vector<1x32x16xf32> to vector<32x16xf32>
    %cst = arith.constant 0.000000e+00 : f32
    %8 = vector.broadcast %cst : f32 to vector<32x32xf32>
    %cst_8 = arith.constant 0.000000e+00 : f32
    %9 = vector.broadcast %cst_8 : f32 to vector<32x32xf32>
    %cst_9 = arith.constant 0.000000e+00 : f32
    %10 = vector.broadcast %cst_9 : f32 to vector<32x32xf32>
    %c0_10 = arith.constant 0 : index
    %c0_11 = arith.constant 0 : index
    %c0_12 = arith.constant 0 : index
    %c0_13 = arith.constant 0 : index
    %11 = vector.load %arg1[%c0_10, %c0_11, %c0_12, %c0_13] : memref<1x3x16x16xf32, #tpu.memory_space<vmem>>, vector<1x1x16x16xf32>
    %12 = vector.shape_cast %11 : vector<1x1x16x16xf32> to vector<16x16xf32>
    %cst_14 = arith.constant dense<0.000000e+00> : vector<32x16xf32>
    %13 = tpu.matmul %1, %12, %cst_14 {dimension_numbers = #tpu.dot_dimension_numbers<[1], [0], [0], [1], [0, 0, 1, 1], [], []>} : vector<32x16xf32>, vector<16x16xf32>, vector<32x16xf32> -> vector<32x16xf32>
    %c0_15 = arith.constant 0 : index
    %c0_16 = arith.constant 0 : index
    %c0_17 = arith.constant 0 : index
    %c0_18 = arith.constant 0 : index
    %c0_19 = arith.constant 0 : index
    %14 = vector.load %arg2[%c0_15, %c0_16, %c0_17, %c0_18, %c0_19] : memref<4x3x3x16x32xf32, #tpu.memory_space<vmem>>, vector<1x1x1x16x32xf32>
    %15 = vector.shape_cast %14 : vector<1x1x1x16x32xf32> to vector<16x32xf32>
    %cst_20 = arith.constant dense<0.000000e+00> : vector<32x32xf32>
    %16 = tpu.matmul %13, %15, %cst_20 {dimension_numbers = #tpu.dot_dimension_numbers<[1], [0], [0], [1], [0, 0, 1, 1], [], []>} : vector<32x16xf32>, vector<16x32xf32>, vector<32x32xf32> -> vector<32x32xf32>
    %17 = arith.addf %8, %16 : vector<32x32xf32>
    %c0_21 = arith.constant 0 : index
    %c1_22 = arith.constant 1 : index
    %c0_23 = arith.constant 0 : index
    %c0_24 = arith.constant 0 : index
    %c0_25 = arith.constant 0 : index
    %18 = vector.load %arg2[%c0_21, %c1_22, %c0_23, %c0_24, %c0_25] : memref<4x3x3x16x32xf32, #tpu.memory_space<vmem>>, vector<1x1x1x16x32xf32>
    %19 = vector.shape_cast %18 : vector<1x1x1x16x32xf32> to vector<16x32xf32>
    %cst_26 = arith.constant dense<0.000000e+00> : vector<32x32xf32>
    %20 = tpu.matmul %13, %19, %cst_26 {dimension_numbers = #tpu.dot_dimension_numbers<[1], [0], [0], [1], [0, 0, 1, 1], [], []>} : vector<32x16xf32>, vector<16x32xf32>, vector<32x32xf32> -> vector<32x32xf32>
    %21 = arith.addf %9, %20 : vector<32x32xf32>
    %c0_27 = arith.constant 0 : index
    %c2_28 = arith.constant 2 : index
    %c0_29 = arith.constant 0 : index
    %c0_30 = arith.constant 0 : index
    %c0_31 = arith.constant 0 : index
    %22 = vector.load %arg2[%c0_27, %c2_28, %c0_29, %c0_30, %c0_31] : memref<4x3x3x16x32xf32, #tpu.memory_space<vmem>>, vector<1x1x1x16x32xf32>
    %23 = vector.shape_cast %22 : vector<1x1x1x16x32xf32> to vector<16x32xf32>
    %cst_32 = arith.constant dense<0.000000e+00> : vector<32x32xf32>
    %24 = tpu.matmul %13, %23, %cst_32 {dimension_numbers = #tpu.dot_dimension_numbers<[1], [0], [0], [1], [0, 0, 1, 1], [], []>} : vector<32x16xf32>, vector<16x32xf32>, vector<32x32xf32> -> vector<32x32xf32>
    %25 = arith.addf %10, %24 : vector<32x32xf32>
    %cst_33 = arith.constant dense<0.000000e+00> : vector<32x16xf32>
    %26 = tpu.matmul %3, %12, %cst_33 {dimension_numbers = #tpu.dot_dimension_numbers<[1], [0], [0], [1], [0, 0, 1, 1], [], []>} : vector<32x16xf32>, vector<16x16xf32>, vector<32x16xf32> -> vector<32x16xf32>
    %c1_34 = arith.constant 1 : index
    %c0_35 = arith.constant 0 : index
    %c0_36 = arith.constant 0 : index
    %c0_37 = arith.constant 0 : index
    %c0_38 = arith.constant 0 : index
    %27 = vector.load %arg2[%c1_34, %c0_35, %c0_36, %c0_37, %c0_38] : memref<4x3x3x16x32xf32, #tpu.memory_space<vmem>>, vector<1x1x1x16x32xf32>
    %28 = vector.shape_cast %27 : vector<1x1x1x16x32xf32> to vector<16x32xf32>
    %cst_39 = arith.constant dense<0.000000e+00> : vector<32x32xf32>
    %29 = tpu.matmul %26, %28, %cst_39 {dimension_numbers = #tpu.dot_dimension_numbers<[1], [0], [0], [1], [0, 0, 1, 1], [], []>} : vector<32x16xf32>, vector<16x32xf32>, vector<32x32xf32> -> vector<32x32xf32>
    %30 = arith.addf %17, %29 : vector<32x32xf32>
    %c1_40 = arith.constant 1 : index
    %c1_41 = arith.constant 1 : index
    %c0_42 = arith.constant 0 : index
    %c0_43 = arith.constant 0 : index
    %c0_44 = arith.constant 0 : index
    %31 = vector.load %arg2[%c1_40, %c1_41, %c0_42, %c0_43, %c0_44] : memref<4x3x3x16x32xf32, #tpu.memory_space<vmem>>, vector<1x1x1x16x32xf32>
    %32 = vector.shape_cast %31 : vector<1x1x1x16x32xf32> to vector<16x32xf32>
    %cst_45 = arith.constant dense<0.000000e+00> : vector<32x32xf32>
    %33 = tpu.matmul %26, %32, %cst_45 {dimension_numbers = #tpu.dot_dimension_numbers<[1], [0], [0], [1], [0, 0, 1, 1], [], []>} : vector<32x16xf32>, vector<16x32xf32>, vector<32x32xf32> -> vector<32x32xf32>
    %34 = arith.addf %21, %33 : vector<32x32xf32>
    %c1_46 = arith.constant 1 : index
    %c2_47 = arith.constant 2 : index
    %c0_48 = arith.constant 0 : index
    %c0_49 = arith.constant 0 : index
    %c0_50 = arith.constant 0 : index
    %35 = vector.load %arg2[%c1_46, %c2_47, %c0_48, %c0_49, %c0_50] : memref<4x3x3x16x32xf32, #tpu.memory_space<vmem>>, vector<1x1x1x16x32xf32>
    %36 = vector.shape_cast %35 : vector<1x1x1x16x32xf32> to vector<16x32xf32>
    %cst_51 = arith.constant dense<0.000000e+00> : vector<32x32xf32>
    %37 = tpu.matmul %26, %36, %cst_51 {dimension_numbers = #tpu.dot_dimension_numbers<[1], [0], [0], [1], [0, 0, 1, 1], [], []>} : vector<32x16xf32>, vector<16x32xf32>, vector<32x32xf32> -> vector<32x32xf32>
    %38 = arith.addf %25, %37 : vector<32x32xf32>
    %cst_52 = arith.constant dense<0.000000e+00> : vector<32x16xf32>
    %39 = tpu.matmul %5, %12, %cst_52 {dimension_numbers = #tpu.dot_dimension_numbers<[1], [0], [0], [1], [0, 0, 1, 1], [], []>} : vector<32x16xf32>, vector<16x16xf32>, vector<32x16xf32> -> vector<32x16xf32>
    %c2_53 = arith.constant 2 : index
    %c0_54 = arith.constant 0 : index
    %c0_55 = arith.constant 0 : index
    %c0_56 = arith.constant 0 : index
    %c0_57 = arith.constant 0 : index
    %40 = vector.load %arg2[%c2_53, %c0_54, %c0_55, %c0_56, %c0_57] : memref<4x3x3x16x32xf32, #tpu.memory_space<vmem>>, vector<1x1x1x16x32xf32>
    %41 = vector.shape_cast %40 : vector<1x1x1x16x32xf32> to vector<16x32xf32>
    %cst_58 = arith.constant dense<0.000000e+00> : vector<32x32xf32>
    %42 = tpu.matmul %39, %41, %cst_58 {dimension_numbers = #tpu.dot_dimension_numbers<[1], [0], [0], [1], [0, 0, 1, 1], [], []>} : vector<32x16xf32>, vector<16x32xf32>, vector<32x32xf32> -> vector<32x32xf32>
    %43 = arith.addf %30, %42 : vector<32x32xf32>
    %c2_59 = arith.constant 2 : index
    %c1_60 = arith.constant 1 : index
    %c0_61 = arith.constant 0 : index
    %c0_62 = arith.constant 0 : index
    %c0_63 = arith.constant 0 : index
    %44 = vector.load %arg2[%c2_59, %c1_60, %c0_61, %c0_62, %c0_63] : memref<4x3x3x16x32xf32, #tpu.memory_space<vmem>>, vector<1x1x1x16x32xf32>
    %45 = vector.shape_cast %44 : vector<1x1x1x16x32xf32> to vector<16x32xf32>
    %cst_64 = arith.constant dense<0.000000e+00> : vector<32x32xf32>
    %46 = tpu.matmul %39, %45, %cst_64 {dimension_numbers = #tpu.dot_dimension_numbers<[1], [0], [0], [1], [0, 0, 1, 1], [], []>} : vector<32x16xf32>, vector<16x32xf32>, vector<32x32xf32> -> vector<32x32xf32>
    %47 = arith.addf %34, %46 : vector<32x32xf32>
    %c2_65 = arith.constant 2 : index
    %c2_66 = arith.constant 2 : index
    %c0_67 = arith.constant 0 : index
    %c0_68 = arith.constant 0 : index
    %c0_69 = arith.constant 0 : index
    %48 = vector.load %arg2[%c2_65, %c2_66, %c0_67, %c0_68, %c0_69] : memref<4x3x3x16x32xf32, #tpu.memory_space<vmem>>, vector<1x1x1x16x32xf32>
    %49 = vector.shape_cast %48 : vector<1x1x1x16x32xf32> to vector<16x32xf32>
    %cst_70 = arith.constant dense<0.000000e+00> : vector<32x32xf32>
    %50 = tpu.matmul %39, %49, %cst_70 {dimension_numbers = #tpu.dot_dimension_numbers<[1], [0], [0], [1], [0, 0, 1, 1], [], []>} : vector<32x16xf32>, vector<16x32xf32>, vector<32x32xf32> -> vector<32x32xf32>
    %51 = arith.addf %38, %50 : vector<32x32xf32>
    %cst_71 = arith.constant dense<0.000000e+00> : vector<32x16xf32>
    %52 = tpu.matmul %7, %12, %cst_71 {dimension_numbers = #tpu.dot_dimension_numbers<[1], [0], [0], [1], [0, 0, 1, 1], [], []>} : vector<32x16xf32>, vector<16x16xf32>, vector<32x16xf32> -> vector<32x16xf32>
    %c3_72 = arith.constant 3 : index
    %c0_73 = arith.constant 0 : index
    %c0_74 = arith.constant 0 : index
    %c0_75 = arith.constant 0 : index
    %c0_76 = arith.constant 0 : index
    %53 = vector.load %arg2[%c3_72, %c0_73, %c0_74, %c0_75, %c0_76] : memref<4x3x3x16x32xf32, #tpu.memory_space<vmem>>, vector<1x1x1x16x32xf32>
    %54 = vector.shape_cast %53 : vector<1x1x1x16x32xf32> to vector<16x32xf32>
    %cst_77 = arith.constant dense<0.000000e+00> : vector<32x32xf32>
    %55 = tpu.matmul %52, %54, %cst_77 {dimension_numbers = #tpu.dot_dimension_numbers<[1], [0], [0], [1], [0, 0, 1, 1], [], []>} : vector<32x16xf32>, vector<16x32xf32>, vector<32x32xf32> -> vector<32x32xf32>
    %56 = arith.addf %43, %55 : vector<32x32xf32>
    %c3_78 = arith.constant 3 : index
    %c1_79 = arith.constant 1 : index
    %c0_80 = arith.constant 0 : index
    %c0_81 = arith.constant 0 : index
    %c0_82 = arith.constant 0 : index
    %57 = vector.load %arg2[%c3_78, %c1_79, %c0_80, %c0_81, %c0_82] : memref<4x3x3x16x32xf32, #tpu.memory_space<vmem>>, vector<1x1x1x16x32xf32>
    %58 = vector.shape_cast %57 : vector<1x1x1x16x32xf32> to vector<16x32xf32>
    %cst_83 = arith.constant dense<0.000000e+00> : vector<32x32xf32>
    %59 = tpu.matmul %52, %58, %cst_83 {dimension_numbers = #tpu.dot_dimension_numbers<[1], [0], [0], [1], [0, 0, 1, 1], [], []>} : vector<32x16xf32>, vector<16x32xf32>, vector<32x32xf32> -> vector<32x32xf32>
    %60 = arith.addf %47, %59 : vector<32x32xf32>
    %c3_84 = arith.constant 3 : index
    %c2_85 = arith.constant 2 : index
    %c0_86 = arith.constant 0 : index
    %c0_87 = arith.constant 0 : index
    %c0_88 = arith.constant 0 : index
    %61 = vector.load %arg2[%c3_84, %c2_85, %c0_86, %c0_87, %c0_88] : memref<4x3x3x16x32xf32, #tpu.memory_space<vmem>>, vector<1x1x1x16x32xf32>
    %62 = vector.shape_cast %61 : vector<1x1x1x16x32xf32> to vector<16x32xf32>
    %cst_89 = arith.constant dense<0.000000e+00> : vector<32x32xf32>
    %63 = tpu.matmul %52, %62, %cst_89 {dimension_numbers = #tpu.dot_dimension_numbers<[1], [0], [0], [1], [0, 0, 1, 1], [], []>} : vector<32x16xf32>, vector<16x32xf32>, vector<32x32xf32> -> vector<32x32xf32>
    %64 = arith.addf %51, %63 : vector<32x32xf32>
    %c0_90 = arith.constant 0 : index
    %c1_91 = arith.constant 1 : index
    %c0_92 = arith.constant 0 : index
    %c0_93 = arith.constant 0 : index
    %65 = vector.load %arg1[%c0_90, %c1_91, %c0_92, %c0_93] : memref<1x3x16x16xf32, #tpu.memory_space<vmem>>, vector<1x1x16x16xf32>
    %66 = vector.shape_cast %65 : vector<1x1x16x16xf32> to vector<16x16xf32>
    %cst_94 = arith.constant dense<0.000000e+00> : vector<32x16xf32>
    %67 = tpu.matmul %1, %66, %cst_94 {dimension_numbers = #tpu.dot_dimension_numbers<[1], [0], [0], [1], [0, 0, 1, 1], [], []>} : vector<32x16xf32>, vector<16x16xf32>, vector<32x16xf32> -> vector<32x16xf32>
    %c0_95 = arith.constant 0 : index
    %c0_96 = arith.constant 0 : index
    %c1_97 = arith.constant 1 : index
    %c0_98 = arith.constant 0 : index
    %c0_99 = arith.constant 0 : index
    %68 = vector.load %arg2[%c0_95, %c0_96, %c1_97, %c0_98, %c0_99] : memref<4x3x3x16x32xf32, #tpu.memory_space<vmem>>, vector<1x1x1x16x32xf32>
    %69 = vector.shape_cast %68 : vector<1x1x1x16x32xf32> to vector<16x32xf32>
    %cst_100 = arith.constant dense<0.000000e+00> : vector<32x32xf32>
    %70 = tpu.matmul %67, %69, %cst_100 {dimension_numbers = #tpu.dot_dimension_numbers<[1], [0], [0], [1], [0, 0, 1, 1], [], []>} : vector<32x16xf32>, vector<16x32xf32>, vector<32x32xf32> -> vector<32x32xf32>
    %71 = arith.addf %56, %70 : vector<32x32xf32>
    %c0_101 = arith.constant 0 : index
    %c1_102 = arith.constant 1 : index
    %c1_103 = arith.constant 1 : index
    %c0_104 = arith.constant 0 : index
    %c0_105 = arith.constant 0 : index
    %72 = vector.load %arg2[%c0_101, %c1_102, %c1_103, %c0_104, %c0_105] : memref<4x3x3x16x32xf32, #tpu.memory_space<vmem>>, vector<1x1x1x16x32xf32>
    %73 = vector.shape_cast %72 : vector<1x1x1x16x32xf32> to vector<16x32xf32>
    %cst_106 = arith.constant dense<0.000000e+00> : vector<32x32xf32>
    %74 = tpu.matmul %67, %73, %cst_106 {dimension_numbers = #tpu.dot_dimension_numbers<[1], [0], [0], [1], [0, 0, 1, 1], [], []>} : vector<32x16xf32>, vector<16x32xf32>, vector<32x32xf32> -> vector<32x32xf32>
    %75 = arith.addf %60, %74 : vector<32x32xf32>
    %c0_107 = arith.constant 0 : index
    %c2_108 = arith.constant 2 : index
    %c1_109 = arith.constant 1 : index
    %c0_110 = arith.constant 0 : index
    %c0_111 = arith.constant 0 : index
    %76 = vector.load %arg2[%c0_107, %c2_108, %c1_109, %c0_110, %c0_111] : memref<4x3x3x16x32xf32, #tpu.memory_space<vmem>>, vector<1x1x1x16x32xf32>
    %77 = vector.shape_cast %76 : vector<1x1x1x16x32xf32> to vector<16x32xf32>
    %cst_112 = arith.constant dense<0.000000e+00> : vector<32x32xf32>
    %78 = tpu.matmul %67, %77, %cst_112 {dimension_numbers = #tpu.dot_dimension_numbers<[1], [0], [0], [1], [0, 0, 1, 1], [], []>} : vector<32x16xf32>, vector<16x32xf32>, vector<32x32xf32> -> vector<32x32xf32>
    %79 = arith.addf %64, %78 : vector<32x32xf32>
    %cst_113 = arith.constant dense<0.000000e+00> : vector<32x16xf32>
    %80 = tpu.matmul %3, %66, %cst_113 {dimension_numbers = #tpu.dot_dimension_numbers<[1], [0], [0], [1], [0, 0, 1, 1], [], []>} : vector<32x16xf32>, vector<16x16xf32>, vector<32x16xf32> -> vector<32x16xf32>
    %c1_114 = arith.constant 1 : index
    %c0_115 = arith.constant 0 : index
    %c1_116 = arith.constant 1 : index
    %c0_117 = arith.constant 0 : index
    %c0_118 = arith.constant 0 : index
    %81 = vector.load %arg2[%c1_114, %c0_115, %c1_116, %c0_117, %c0_118] : memref<4x3x3x16x32xf32, #tpu.memory_space<vmem>>, vector<1x1x1x16x32xf32>
    %82 = vector.shape_cast %81 : vector<1x1x1x16x32xf32> to vector<16x32xf32>
    %cst_119 = arith.constant dense<0.000000e+00> : vector<32x32xf32>
    %83 = tpu.matmul %80, %82, %cst_119 {dimension_numbers = #tpu.dot_dimension_numbers<[1], [0], [0], [1], [0, 0, 1, 1], [], []>} : vector<32x16xf32>, vector<16x32xf32>, vector<32x32xf32> -> vector<32x32xf32>
    %84 = arith.addf %71, %83 : vector<32x32xf32>
    %c1_120 = arith.constant 1 : index
    %c1_121 = arith.constant 1 : index
    %c1_122 = arith.constant 1 : index
    %c0_123 = arith.constant 0 : index
    %c0_124 = arith.constant 0 : index
    %85 = vector.load %arg2[%c1_120, %c1_121, %c1_122, %c0_123, %c0_124] : memref<4x3x3x16x32xf32, #tpu.memory_space<vmem>>, vector<1x1x1x16x32xf32>
    %86 = vector.shape_cast %85 : vector<1x1x1x16x32xf32> to vector<16x32xf32>
    %cst_125 = arith.constant dense<0.000000e+00> : vector<32x32xf32>
    %87 = tpu.matmul %80, %86, %cst_125 {dimension_numbers = #tpu.dot_dimension_numbers<[1], [0], [0], [1], [0, 0, 1, 1], [], []>} : vector<32x16xf32>, vector<16x32xf32>, vector<32x32xf32> -> vector<32x32xf32>
    %88 = arith.addf %75, %87 : vector<32x32xf32>
    %c1_126 = arith.constant 1 : index
    %c2_127 = arith.constant 2 : index
    %c1_128 = arith.constant 1 : index
    %c0_129 = arith.constant 0 : index
    %c0_130 = arith.constant 0 : index
    %89 = vector.load %arg2[%c1_126, %c2_127, %c1_128, %c0_129, %c0_130] : memref<4x3x3x16x32xf32, #tpu.memory_space<vmem>>, vector<1x1x1x16x32xf32>
    %90 = vector.shape_cast %89 : vector<1x1x1x16x32xf32> to vector<16x32xf32>
    %cst_131 = arith.constant dense<0.000000e+00> : vector<32x32xf32>
    %91 = tpu.matmul %80, %90, %cst_131 {dimension_numbers = #tpu.dot_dimension_numbers<[1], [0], [0], [1], [0, 0, 1, 1], [], []>} : vector<32x16xf32>, vector<16x32xf32>, vector<32x32xf32> -> vector<32x32xf32>
    %92 = arith.addf %79, %91 : vector<32x32xf32>
    %cst_132 = arith.constant dense<0.000000e+00> : vector<32x16xf32>
    %93 = tpu.matmul %5, %66, %cst_132 {dimension_numbers = #tpu.dot_dimension_numbers<[1], [0], [0], [1], [0, 0, 1, 1], [], []>} : vector<32x16xf32>, vector<16x16xf32>, vector<32x16xf32> -> vector<32x16xf32>
    %c2_133 = arith.constant 2 : index
    %c0_134 = arith.constant 0 : index
    %c1_135 = arith.constant 1 : index
    %c0_136 = arith.constant 0 : index
    %c0_137 = arith.constant 0 : index
    %94 = vector.load %arg2[%c2_133, %c0_134, %c1_135, %c0_136, %c0_137] : memref<4x3x3x16x32xf32, #tpu.memory_space<vmem>>, vector<1x1x1x16x32xf32>
    %95 = vector.shape_cast %94 : vector<1x1x1x16x32xf32> to vector<16x32xf32>
    %cst_138 = arith.constant dense<0.000000e+00> : vector<32x32xf32>
    %96 = tpu.matmul %93, %95, %cst_138 {dimension_numbers = #tpu.dot_dimension_numbers<[1], [0], [0], [1], [0, 0, 1, 1], [], []>} : vector<32x16xf32>, vector<16x32xf32>, vector<32x32xf32> -> vector<32x32xf32>
    %97 = arith.addf %84, %96 : vector<32x32xf32>
    %c2_139 = arith.constant 2 : index
    %c1_140 = arith.constant 1 : index
    %c1_141 = arith.constant 1 : index
    %c0_142 = arith.constant 0 : index
    %c0_143 = arith.constant 0 : index
    %98 = vector.load %arg2[%c2_139, %c1_140, %c1_141, %c0_142, %c0_143] : memref<4x3x3x16x32xf32, #tpu.memory_space<vmem>>, vector<1x1x1x16x32xf32>
    %99 = vector.shape_cast %98 : vector<1x1x1x16x32xf32> to vector<16x32xf32>
    %cst_144 = arith.constant dense<0.000000e+00> : vector<32x32xf32>
    %100 = tpu.matmul %93, %99, %cst_144 {dimension_numbers = #tpu.dot_dimension_numbers<[1], [0], [0], [1], [0, 0, 1, 1], [], []>} : vector<32x16xf32>, vector<16x32xf32>, vector<32x32xf32> -> vector<32x32xf32>
    %101 = arith.addf %88, %100 : vector<32x32xf32>
    %c2_145 = arith.constant 2 : index
    %c2_146 = arith.constant 2 : index
    %c1_147 = arith.constant 1 : index
    %c0_148 = arith.constant 0 : index
    %c0_149 = arith.constant 0 : index
    %102 = vector.load %arg2[%c2_145, %c2_146, %c1_147, %c0_148, %c0_149] : memref<4x3x3x16x32xf32, #tpu.memory_space<vmem>>, vector<1x1x1x16x32xf32>
    %103 = vector.shape_cast %102 : vector<1x1x1x16x32xf32> to vector<16x32xf32>
    %cst_150 = arith.constant dense<0.000000e+00> : vector<32x32xf32>
    %104 = tpu.matmul %93, %103, %cst_150 {dimension_numbers = #tpu.dot_dimension_numbers<[1], [0], [0], [1], [0, 0, 1, 1], [], []>} : vector<32x16xf32>, vector<16x32xf32>, vector<32x32xf32> -> vector<32x32xf32>
    %105 = arith.addf %92, %104 : vector<32x32xf32>
    %cst_151 = arith.constant dense<0.000000e+00> : vector<32x16xf32>
    %106 = tpu.matmul %7, %66, %cst_151 {dimension_numbers = #tpu.dot_dimension_numbers<[1], [0], [0], [1], [0, 0, 1, 1], [], []>} : vector<32x16xf32>, vector<16x16xf32>, vector<32x16xf32> -> vector<32x16xf32>
    %c3_152 = arith.constant 3 : index
    %c0_153 = arith.constant 0 : index
    %c1_154 = arith.constant 1 : index
    %c0_155 = arith.constant 0 : index
    %c0_156 = arith.constant 0 : index
    %107 = vector.load %arg2[%c3_152, %c0_153, %c1_154, %c0_155, %c0_156] : memref<4x3x3x16x32xf32, #tpu.memory_space<vmem>>, vector<1x1x1x16x32xf32>
    %108 = vector.shape_cast %107 : vector<1x1x1x16x32xf32> to vector<16x32xf32>
    %cst_157 = arith.constant dense<0.000000e+00> : vector<32x32xf32>
    %109 = tpu.matmul %106, %108, %cst_157 {dimension_numbers = #tpu.dot_dimension_numbers<[1], [0], [0], [1], [0, 0, 1, 1], [], []>} : vector<32x16xf32>, vector<16x32xf32>, vector<32x32xf32> -> vector<32x32xf32>
    %110 = arith.addf %97, %109 : vector<32x32xf32>
    %c3_158 = arith.constant 3 : index
    %c1_159 = arith.constant 1 : index
    %c1_160 = arith.constant 1 : index
    %c0_161 = arith.constant 0 : index
    %c0_162 = arith.constant 0 : index
    %111 = vector.load %arg2[%c3_158, %c1_159, %c1_160, %c0_161, %c0_162] : memref<4x3x3x16x32xf32, #tpu.memory_space<vmem>>, vector<1x1x1x16x32xf32>
    %112 = vector.shape_cast %111 : vector<1x1x1x16x32xf32> to vector<16x32xf32>
    %cst_163 = arith.constant dense<0.000000e+00> : vector<32x32xf32>
    %113 = tpu.matmul %106, %112, %cst_163 {dimension_numbers = #tpu.dot_dimension_numbers<[1], [0], [0], [1], [0, 0, 1, 1], [], []>} : vector<32x16xf32>, vector<16x32xf32>, vector<32x32xf32> -> vector<32x32xf32>
    %114 = arith.addf %101, %113 : vector<32x32xf32>
    %c3_164 = arith.constant 3 : index
    %c2_165 = arith.constant 2 : index
    %c1_166 = arith.constant 1 : index
    %c0_167 = arith.constant 0 : index
    %c0_168 = arith.constant 0 : index
    %115 = vector.load %arg2[%c3_164, %c2_165, %c1_166, %c0_167, %c0_168] : memref<4x3x3x16x32xf32, #tpu.memory_space<vmem>>, vector<1x1x1x16x32xf32>
    %116 = vector.shape_cast %115 : vector<1x1x1x16x32xf32> to vector<16x32xf32>
    %cst_169 = arith.constant dense<0.000000e+00> : vector<32x32xf32>
    %117 = tpu.matmul %106, %116, %cst_169 {dimension_numbers = #tpu.dot_dimension_numbers<[1], [0], [0], [1], [0, 0, 1, 1], [], []>} : vector<32x16xf32>, vector<16x32xf32>, vector<32x32xf32> -> vector<32x32xf32>
    %118 = arith.addf %105, %117 : vector<32x32xf32>
    %c0_170 = arith.constant 0 : index
    %c2_171 = arith.constant 2 : index
    %c0_172 = arith.constant 0 : index
    %c0_173 = arith.constant 0 : index
    %119 = vector.load %arg1[%c0_170, %c2_171, %c0_172, %c0_173] : memref<1x3x16x16xf32, #tpu.memory_space<vmem>>, vector<1x1x16x16xf32>
    %120 = vector.shape_cast %119 : vector<1x1x16x16xf32> to vector<16x16xf32>
    %cst_174 = arith.constant dense<0.000000e+00> : vector<32x16xf32>
    %121 = tpu.matmul %1, %120, %cst_174 {dimension_numbers = #tpu.dot_dimension_numbers<[1], [0], [0], [1], [0, 0, 1, 1], [], []>} : vector<32x16xf32>, vector<16x16xf32>, vector<32x16xf32> -> vector<32x16xf32>
    %c0_175 = arith.constant 0 : index
    %c0_176 = arith.constant 0 : index
    %c2_177 = arith.constant 2 : index
    %c0_178 = arith.constant 0 : index
    %c0_179 = arith.constant 0 : index
    %122 = vector.load %arg2[%c0_175, %c0_176, %c2_177, %c0_178, %c0_179] : memref<4x3x3x16x32xf32, #tpu.memory_space<vmem>>, vector<1x1x1x16x32xf32>
    %123 = vector.shape_cast %122 : vector<1x1x1x16x32xf32> to vector<16x32xf32>
    %cst_180 = arith.constant dense<0.000000e+00> : vector<32x32xf32>
    %124 = tpu.matmul %121, %123, %cst_180 {dimension_numbers = #tpu.dot_dimension_numbers<[1], [0], [0], [1], [0, 0, 1, 1], [], []>} : vector<32x16xf32>, vector<16x32xf32>, vector<32x32xf32> -> vector<32x32xf32>
    %125 = arith.addf %110, %124 : vector<32x32xf32>
    %c0_181 = arith.constant 0 : index
    %c1_182 = arith.constant 1 : index
    %c2_183 = arith.constant 2 : index
    %c0_184 = arith.constant 0 : index
    %c0_185 = arith.constant 0 : index
    %126 = vector.load %arg2[%c0_181, %c1_182, %c2_183, %c0_184, %c0_185] : memref<4x3x3x16x32xf32, #tpu.memory_space<vmem>>, vector<1x1x1x16x32xf32>
    %127 = vector.shape_cast %126 : vector<1x1x1x16x32xf32> to vector<16x32xf32>
    %cst_186 = arith.constant dense<0.000000e+00> : vector<32x32xf32>
    %128 = tpu.matmul %121, %127, %cst_186 {dimension_numbers = #tpu.dot_dimension_numbers<[1], [0], [0], [1], [0, 0, 1, 1], [], []>} : vector<32x16xf32>, vector<16x32xf32>, vector<32x32xf32> -> vector<32x32xf32>
    %129 = arith.addf %114, %128 : vector<32x32xf32>
    %c0_187 = arith.constant 0 : index
    %c2_188 = arith.constant 2 : index
    %c2_189 = arith.constant 2 : index
    %c0_190 = arith.constant 0 : index
    %c0_191 = arith.constant 0 : index
    %130 = vector.load %arg2[%c0_187, %c2_188, %c2_189, %c0_190, %c0_191] : memref<4x3x3x16x32xf32, #tpu.memory_space<vmem>>, vector<1x1x1x16x32xf32>
    %131 = vector.shape_cast %130 : vector<1x1x1x16x32xf32> to vector<16x32xf32>
    %cst_192 = arith.constant dense<0.000000e+00> : vector<32x32xf32>
    %132 = tpu.matmul %121, %131, %cst_192 {dimension_numbers = #tpu.dot_dimension_numbers<[1], [0], [0], [1], [0, 0, 1, 1], [], []>} : vector<32x16xf32>, vector<16x32xf32>, vector<32x32xf32> -> vector<32x32xf32>
    %133 = arith.addf %118, %132 : vector<32x32xf32>
    %cst_193 = arith.constant dense<0.000000e+00> : vector<32x16xf32>
    %134 = tpu.matmul %3, %120, %cst_193 {dimension_numbers = #tpu.dot_dimension_numbers<[1], [0], [0], [1], [0, 0, 1, 1], [], []>} : vector<32x16xf32>, vector<16x16xf32>, vector<32x16xf32> -> vector<32x16xf32>
    %c1_194 = arith.constant 1 : index
    %c0_195 = arith.constant 0 : index
    %c2_196 = arith.constant 2 : index
    %c0_197 = arith.constant 0 : index
    %c0_198 = arith.constant 0 : index
    %135 = vector.load %arg2[%c1_194, %c0_195, %c2_196, %c0_197, %c0_198] : memref<4x3x3x16x32xf32, #tpu.memory_space<vmem>>, vector<1x1x1x16x32xf32>
    %136 = vector.shape_cast %135 : vector<1x1x1x16x32xf32> to vector<16x32xf32>
    %cst_199 = arith.constant dense<0.000000e+00> : vector<32x32xf32>
    %137 = tpu.matmul %134, %136, %cst_199 {dimension_numbers = #tpu.dot_dimension_numbers<[1], [0], [0], [1], [0, 0, 1, 1], [], []>} : vector<32x16xf32>, vector<16x32xf32>, vector<32x32xf32> -> vector<32x32xf32>
    %138 = arith.addf %125, %137 : vector<32x32xf32>
    %c1_200 = arith.constant 1 : index
    %c1_201 = arith.constant 1 : index
    %c2_202 = arith.constant 2 : index
    %c0_203 = arith.constant 0 : index
    %c0_204 = arith.constant 0 : index
    %139 = vector.load %arg2[%c1_200, %c1_201, %c2_202, %c0_203, %c0_204] : memref<4x3x3x16x32xf32, #tpu.memory_space<vmem>>, vector<1x1x1x16x32xf32>
    %140 = vector.shape_cast %139 : vector<1x1x1x16x32xf32> to vector<16x32xf32>
    %cst_205 = arith.constant dense<0.000000e+00> : vector<32x32xf32>
    %141 = tpu.matmul %134, %140, %cst_205 {dimension_numbers = #tpu.dot_dimension_numbers<[1], [0], [0], [1], [0, 0, 1, 1], [], []>} : vector<32x16xf32>, vector<16x32xf32>, vector<32x32xf32> -> vector<32x32xf32>
    %142 = arith.addf %129, %141 : vector<32x32xf32>
    %c1_206 = arith.constant 1 : index
    %c2_207 = arith.constant 2 : index
    %c2_208 = arith.constant 2 : index
    %c0_209 = arith.constant 0 : index
    %c0_210 = arith.constant 0 : index
    %143 = vector.load %arg2[%c1_206, %c2_207, %c2_208, %c0_209, %c0_210] : memref<4x3x3x16x32xf32, #tpu.memory_space<vmem>>, vector<1x1x1x16x32xf32>
    %144 = vector.shape_cast %143 : vector<1x1x1x16x32xf32> to vector<16x32xf32>
    %cst_211 = arith.constant dense<0.000000e+00> : vector<32x32xf32>
    %145 = tpu.matmul %134, %144, %cst_211 {dimension_numbers = #tpu.dot_dimension_numbers<[1], [0], [0], [1], [0, 0, 1, 1], [], []>} : vector<32x16xf32>, vector<16x32xf32>, vector<32x32xf32> -> vector<32x32xf32>
    %146 = arith.addf %133, %145 : vector<32x32xf32>
    %cst_212 = arith.constant dense<0.000000e+00> : vector<32x16xf32>
    %147 = tpu.matmul %5, %120, %cst_212 {dimension_numbers = #tpu.dot_dimension_numbers<[1], [0], [0], [1], [0, 0, 1, 1], [], []>} : vector<32x16xf32>, vector<16x16xf32>, vector<32x16xf32> -> vector<32x16xf32>
    %c2_213 = arith.constant 2 : index
    %c0_214 = arith.constant 0 : index
    %c2_215 = arith.constant 2 : index
    %c0_216 = arith.constant 0 : index
    %c0_217 = arith.constant 0 : index
    %148 = vector.load %arg2[%c2_213, %c0_214, %c2_215, %c0_216, %c0_217] : memref<4x3x3x16x32xf32, #tpu.memory_space<vmem>>, vector<1x1x1x16x32xf32>
    %149 = vector.shape_cast %148 : vector<1x1x1x16x32xf32> to vector<16x32xf32>
    %cst_218 = arith.constant dense<0.000000e+00> : vector<32x32xf32>
    %150 = tpu.matmul %147, %149, %cst_218 {dimension_numbers = #tpu.dot_dimension_numbers<[1], [0], [0], [1], [0, 0, 1, 1], [], []>} : vector<32x16xf32>, vector<16x32xf32>, vector<32x32xf32> -> vector<32x32xf32>
    %151 = arith.addf %138, %150 : vector<32x32xf32>
    %c2_219 = arith.constant 2 : index
    %c1_220 = arith.constant 1 : index
    %c2_221 = arith.constant 2 : index
    %c0_222 = arith.constant 0 : index
    %c0_223 = arith.constant 0 : index
    %152 = vector.load %arg2[%c2_219, %c1_220, %c2_221, %c0_222, %c0_223] : memref<4x3x3x16x32xf32, #tpu.memory_space<vmem>>, vector<1x1x1x16x32xf32>
    %153 = vector.shape_cast %152 : vector<1x1x1x16x32xf32> to vector<16x32xf32>
    %cst_224 = arith.constant dense<0.000000e+00> : vector<32x32xf32>
    %154 = tpu.matmul %147, %153, %cst_224 {dimension_numbers = #tpu.dot_dimension_numbers<[1], [0], [0], [1], [0, 0, 1, 1], [], []>} : vector<32x16xf32>, vector<16x32xf32>, vector<32x32xf32> -> vector<32x32xf32>
    %155 = arith.addf %142, %154 : vector<32x32xf32>
    %c2_225 = arith.constant 2 : index
    %c2_226 = arith.constant 2 : index
    %c2_227 = arith.constant 2 : index
    %c0_228 = arith.constant 0 : index
    %c0_229 = arith.constant 0 : index
    %156 = vector.load %arg2[%c2_225, %c2_226, %c2_227, %c0_228, %c0_229] : memref<4x3x3x16x32xf32, #tpu.memory_space<vmem>>, vector<1x1x1x16x32xf32>
    %157 = vector.shape_cast %156 : vector<1x1x1x16x32xf32> to vector<16x32xf32>
    %cst_230 = arith.constant dense<0.000000e+00> : vector<32x32xf32>
    %158 = tpu.matmul %147, %157, %cst_230 {dimension_numbers = #tpu.dot_dimension_numbers<[1], [0], [0], [1], [0, 0, 1, 1], [], []>} : vector<32x16xf32>, vector<16x32xf32>, vector<32x32xf32> -> vector<32x32xf32>
    %159 = arith.addf %146, %158 : vector<32x32xf32>
    %cst_231 = arith.constant dense<0.000000e+00> : vector<32x16xf32>
    %160 = tpu.matmul %7, %120, %cst_231 {dimension_numbers = #tpu.dot_dimension_numbers<[1], [0], [0], [1], [0, 0, 1, 1], [], []>} : vector<32x16xf32>, vector<16x16xf32>, vector<32x16xf32> -> vector<32x16xf32>
    %c3_232 = arith.constant 3 : index
    %c0_233 = arith.constant 0 : index
    %c2_234 = arith.constant 2 : index
    %c0_235 = arith.constant 0 : index
    %c0_236 = arith.constant 0 : index
    %161 = vector.load %arg2[%c3_232, %c0_233, %c2_234, %c0_235, %c0_236] : memref<4x3x3x16x32xf32, #tpu.memory_space<vmem>>, vector<1x1x1x16x32xf32>
    %162 = vector.shape_cast %161 : vector<1x1x1x16x32xf32> to vector<16x32xf32>
    %cst_237 = arith.constant dense<0.000000e+00> : vector<32x32xf32>
    %163 = tpu.matmul %160, %162, %cst_237 {dimension_numbers = #tpu.dot_dimension_numbers<[1], [0], [0], [1], [0, 0, 1, 1], [], []>} : vector<32x16xf32>, vector<16x32xf32>, vector<32x32xf32> -> vector<32x32xf32>
    %164 = arith.addf %151, %163 : vector<32x32xf32>
    %c3_238 = arith.constant 3 : index
    %c1_239 = arith.constant 1 : index
    %c2_240 = arith.constant 2 : index
    %c0_241 = arith.constant 0 : index
    %c0_242 = arith.constant 0 : index
    %165 = vector.load %arg2[%c3_238, %c1_239, %c2_240, %c0_241, %c0_242] : memref<4x3x3x16x32xf32, #tpu.memory_space<vmem>>, vector<1x1x1x16x32xf32>
    %166 = vector.shape_cast %165 : vector<1x1x1x16x32xf32> to vector<16x32xf32>
    %cst_243 = arith.constant dense<0.000000e+00> : vector<32x32xf32>
    %167 = tpu.matmul %160, %166, %cst_243 {dimension_numbers = #tpu.dot_dimension_numbers<[1], [0], [0], [1], [0, 0, 1, 1], [], []>} : vector<32x16xf32>, vector<16x32xf32>, vector<32x32xf32> -> vector<32x32xf32>
    %168 = arith.addf %155, %167 : vector<32x32xf32>
    %c3_244 = arith.constant 3 : index
    %c2_245 = arith.constant 2 : index
    %c2_246 = arith.constant 2 : index
    %c0_247 = arith.constant 0 : index
    %c0_248 = arith.constant 0 : index
    %169 = vector.load %arg2[%c3_244, %c2_245, %c2_246, %c0_247, %c0_248] : memref<4x3x3x16x32xf32, #tpu.memory_space<vmem>>, vector<1x1x1x16x32xf32>
    %170 = vector.shape_cast %169 : vector<1x1x1x16x32xf32> to vector<16x32xf32>
    %cst_249 = arith.constant dense<0.000000e+00> : vector<32x32xf32>
    %171 = tpu.matmul %160, %170, %cst_249 {dimension_numbers = #tpu.dot_dimension_numbers<[1], [0], [0], [1], [0, 0, 1, 1], [], []>} : vector<32x16xf32>, vector<16x32xf32>, vector<32x32xf32> -> vector<32x32xf32>
    %172 = arith.addf %159, %171 : vector<32x32xf32>
    %c0_250 = arith.constant 0 : index
    %173 = memref.load %arg4[%c0_250] : memref<3xf32, #tpu.memory_space<smem>>
    %174 = vector.broadcast %173 : f32 to vector<32x32xf32>
    %175 = arith.addf %164, %174 : vector<32x32xf32>
    %c0_251 = arith.constant 0 : index
    %c0_252 = arith.constant 0 : index
    %c0_253 = arith.constant 0 : index
    %c0_254 = arith.constant 0 : index
    %176 = vector.load %arg5[%c0_251, %c0_252, %c0_253, %c0_254] : memref<1x3x32x32xf32, #tpu.memory_space<vmem>>, vector<1x1x32x32xf32>
    %177 = vector.shape_cast %176 : vector<1x1x32x32xf32> to vector<32x32xf32>
    %178 = vector.shape_cast %175 : vector<32x32xf32> to vector<1x1x32x32xf32>
    tpu.vector_store %arg5[%c0_251, %c0_252, %c0_253, %c0_254], %178 {strides = array<i32>} : memref<1x3x32x32xf32, #tpu.memory_space<vmem>>, vector<1x1x32x32xf32>,
    %c1_255 = arith.constant 1 : index
    %179 = memref.load %arg4[%c1_255] : memref<3xf32, #tpu.memory_space<smem>>
    %180 = vector.broadcast %179 : f32 to vector<32x32xf32>
    %181 = arith.addf %168, %180 : vector<32x32xf32>
    %c0_256 = arith.constant 0 : index
    %c1_257 = arith.constant 1 : index
    %c0_258 = arith.constant 0 : index
    %c0_259 = arith.constant 0 : index
    %182 = vector.load %arg5[%c0_256, %c1_257, %c0_258, %c0_259] : memref<1x3x32x32xf32, #tpu.memory_space<vmem>>, vector<1x1x32x32xf32>
    %183 = vector.shape_cast %182 : vector<1x1x32x32xf32> to vector<32x32xf32>
    %184 = vector.shape_cast %181 : vector<32x32xf32> to vector<1x1x32x32xf32>
    tpu.vector_store %arg5[%c0_256, %c1_257, %c0_258, %c0_259], %184 {strides = array<i32>} : memref<1x3x32x32xf32, #tpu.memory_space<vmem>>, vector<1x1x32x32xf32>,
    %c2_260 = arith.constant 2 : index
    %185 = memref.load %arg4[%c2_260] : memref<3xf32, #tpu.memory_space<smem>>
    %186 = vector.broadcast %185 : f32 to vector<32x32xf32>
    %187 = arith.addf %172, %186 : vector<32x32xf32>
    %c0_261 = arith.constant 0 : index
    %c2_262 = arith.constant 2 : index
    %c0_263 = arith.constant 0 : index
    %c0_264 = arith.constant 0 : index
    %188 = vector.load %arg5[%c0_261, %c2_262, %c0_263, %c0_264] : memref<1x3x32x32xf32, #tpu.memory_space<vmem>>, vector<1x1x32x32xf32>
    %189 = vector.shape_cast %188 : vector<1x1x32x32xf32> to vector<32x32xf32>
    %190 = vector.shape_cast %187 : vector<32x32xf32> to vector<1x1x32x32xf32>
    tpu.vector_store %arg5[%c0_261, %c2_262, %c0_263, %c0_264], %190 {strides = array<i32>} : memref<1x3x32x32xf32, #tpu.memory_space<vmem>>, vector<1x1x32x32xf32>,
    return
  }
  func.func @transform_0(%arg0: i32) -> (i32, i32, i32, i32) {
    %c0_i32 = arith.constant 0 : i32
    %c0_i32_0 = arith.constant 0 : i32
    %c0_i32_1 = arith.constant 0 : i32
    %c0_i32_2 = arith.constant 0 : i32
    return %arg0, %c0_i32, %c0_i32_0, %c0_i32_1 : i32, i32, i32, i32
  }
  func.func @transform_1(%arg0: i32) -> (i32, i32, i32, i32, i32) {
    %c0_i32 = arith.constant 0 : i32
    %c0_i32_0 = arith.constant 0 : i32
    %c0_i32_1 = arith.constant 0 : i32
    %c0_i32_2 = arith.constant 0 : i32
    %c0_i32_3 = arith.constant 0 : i32
    %c0_i32_4 = arith.constant 0 : i32
    return %c0_i32, %c0_i32_0, %c0_i32_1, %c0_i32_2, %c0_i32_3 : i32, i32, i32, i32, i32
  }
  func.func @transform_2(%arg0: i32) -> (i32, i32, i32) {
    %c0_i32 = arith.constant 0 : i32
    %c0_i32_0 = arith.constant 0 : i32
    %c0_i32_1 = arith.constant 0 : i32
    %c0_i32_2 = arith.constant 0 : i32
    return %c0_i32, %c0_i32_0, %c0_i32_1 : i32, i32, i32
  }
  func.func @transform_3(%arg0: i32) -> i32 {
    %c0_i32 = arith.constant 0 : i32
    %c0_i32_0 = arith.constant 0 : i32
    return %c0_i32 : i32
  }
  func.func @transform_4(%arg0: i32) -> (i32, i32, i32, i32) {
    %c0_i32 = arith.constant 0 : i32
    %c0_i32_0 = arith.constant 0 : i32
    %c0_i32_1 = arith.constant 0 : i32
    %c0_i32_2 = arith.constant 0 : i32
    return %arg0, %c0_i32, %c0_i32_0, %c0_i32_1 : i32, i32, i32, i32
  }
}

</mosaic_0001>

<bundles_post_ra>
// kernel: tpu_custom_call.1
= control target key start
LH: loop header
LB: loop body
LE: loop exit
PB: predicated region body
PF: predicated region fallthrough
CT: control target
= control target key end

     0   :  { %9 = vsyncpa [#allocation3], 0  ;;  %s6973_s0 = inlined_call_operand.vmem [shape: f32[2,3,16,16], index: 0, kind: input, shape index: {}]   ;;  %s6974_s1 = inlined_call_operand.hbm [shape: f32[4,3,3,16,32], index: 1, kind: input, shape index: {}]   ;;  %s6975_s2 = inlined_call_operand.vmem [shape: f32[4,32,16], index: 2, kind: input, shape index: {}]   ;;  %s6976_s3 = inlined_call_operand.vmem [shape: f32[3], index: 3, kind: input, shape index: {}]   ;;  %s6977_s4 = inlined_call_operand.hbm [shape: f32[2,3,32,32], index: 4, kind: output, shape index: {}]  }
   0x1   :  { %10 = vsyncpa [#allocation5], 0 }
   0x2   :  { %11 = vsyncpa [#allocation4], 0 }
   0x3   :  { %13 = vsyncpa [#allocation4 + $0x1], 0  ;;  %s6421_s15 = smov 0   ;;  %s6423_s16 = smov 0  }
   0x4   :  { %s6425_s17 = smov 0   ;;  %s6427_s18 = smov 0  }
   0x5 LB: > { %s6442_s19 = sadd.s32 4294967295, %s6387_s18   ;;  %s4885_s20 = sadd.s32 4294967294, %s6387_s18   ;;  %s6387_s18 = sphi %s6427_s18, %s6995_s18   ;;  %s6383_s17 = sphi %s6425_s17, %s6994_s17   ;;  %s6379_s16 = sphi %s6423_s16, %s6993_s16   ;;  %s6375_s15 = sphi %s6421_s15, %s6992_s15  }
   0x6   : > { %s6446_s21 = sadd.s32 1, %s6387_s18   ;;  %s115_s22 = sadd.s32 1, %s6383_s17 }
   0x7   : > { %s112_s23 = ssub.s32 %s6387_s18, %s6446_s21  ;;  %p125_p0 = scmp.ne.s32.totalorder %s6383_s17, %s6379_s16 }
   0x8   : > { %p113_p1 = scmp.eq.s32.totalorder %s112_s23, 0  ;;  %p126_p2 = scmp.eq.s32.totalorder %s6442_s19, 1 }
   0x9   : > { %p131_p3 = scmp.ne.s32.totalorder %s6379_s16, %s6375_s15  ;;  %p132_p4 = scmp.eq.s32.totalorder %s4885_s20, 1 }
   0xa   : > { %s6457_s24 = scalar_select %p113_p1, %s6383_s17, %s115_s22  }
   0xb   : > { %p6459_p5 = por %p126_p2, %p125_p0  ;;  %p6463_p6 = por %p132_p4, %p131_p3 }
   0xc   : > { %p4886_p7 = scmp.ge.s32.totalorder %s6387_s18, 1  ;;  %p139_p8 = scmp.lt.s32.totalorder %s6387_s18, 3 }
   0xd   : > { %s6981_s25 = scalar_select %p6459_p5, 1, 0 }
   0xe   : > { %s6982_s26 = scalar_select %p6463_p6, 1, 0 }
   0xf   : > { %p6978_p9 = scmp.eq.s32.totalorder %s6442_s19, 0  ;;  %p6470_p10 = pnand %p4886_p7, %p139_p8 }
  0x10   : > { %s6389_s28 = smov [#allocation2]   ;;  %s168_s6 = sshll.u32 %s6976_s3, 4  ;;  %s6485_s6 = int_to_ptr.vmem [resolvable:$true] %s168_s6 }
  0x11   : > { %s6983_s27 = scalar_select %p6470_p10, 1, 0 }
  0x12   : > { %s151_s29 = sshll.u32 %s6389_s28, 4  ;;  %p6220_p11 = pneg %p6470_p10  ;;  %s152_s29 = int_to_ptr.vmem [resolvable:$true] %s151_s29 }
  0x13   : > { %s6274_s10 = scalar_lea.hbm %s6974_s1, 9216 }
  0x14   : > { %p6481_p12 = pnand %p6978_p9, %p6220_p11  ;;  %p6275_p13 = scmp.ne.s32.totalorder %s6974_s1, %s6274_s10 }
  0x15   : > { %p6281_p3 = scmp.lt.u32.totalorder %s6274_s10, %s6974_s1 }
  0x16   : > { %p6276_p0 = pneg %p6481_p12 }
  0x18   : > { %p6277_p1 = pnand %p6276_p0, %p6275_p13 }
  0x1a   : > { %p6278_p2 = pneg %p6277_p1 }
  0x1c   : > { %p6283_p4 = pnand %p6281_p3, %p6278_p2 }
  0x1e   : > { %6286 = shalt.err (!%p6283_p4)
}
  0x1f   : > { %s6287_s20 = scalar_lea.vmem %s152_s29, 9216  ;;  %p6295_p9 = scmp.lt.s32.totalorder %s152_s29, %s152_s29 }
  0x20   : > { %p6288_p7 = scmp.ne.s32.totalorder %s152_s29, %s6287_s20  ;;  %p6296_p6 = scmp.lt.s32.totalorder %s6287_s20, %s6287_s20 }
  0x22   : > { %p6290_p8 = pnand %p6288_p7, %p6276_p0  ;;  %p6297_p5 = por %p6296_p6, %p6295_p9 }
  0x24   : > { %p6291_p11 = pneg %p6290_p8 }
  0x26   : > { %p6298_p10 = pnand %p6297_p5, %p6291_p11 }
  0x28   : > { %6301 = shalt.err (!%p6298_p10)
}
  0x29   : > { %s6390_s22 = smov 128   ;;  %s6391_s23 = smov 8  }
  0x2a   : > { %6223 = dma.hbm_to_vmem [thread:$0]  (!%p6481_p12), %s6974_s1, 9216, %s152_s29, [#allocation3], %s6390_s22, %s6390_s22, %s6391_s23  }
  0x2b   : > { %s6302_s5 = scalar_lea.vmem %s6485_s6, 16  ;;  %p6310_p5 = scmp.lt.s32.totalorder %s6485_s6, %s6485_s6 }
  0x2c   : > { %p6303_p13 = scmp.ne.s32.totalorder %s6485_s6, %s6302_s5  ;;  %p6311_p9 = scmp.lt.s32.totalorder %s6302_s5, %s6302_s5 }
  0x2e   : > { %p6305_p1 = pnand %p6303_p13, %p6276_p0  ;;  %p6312_p10 = por %p6311_p9, %p6310_p5 }
  0x30   : > { %p6306_p6 = pneg %p6305_p1 }
  0x32   : > { %p6313_p2 = pnand %p6312_p10, %p6306_p6 }
  0x34   : > { %6316 = shalt.err (!%p6313_p2)
}
  0x35   : > { %s6392_s8 = smov [#allocation6]   ;;  %p6985_p3 = scmp.ne.s32.totalorder %s6983_s27, 0 }
  0x36   : > { %6226 = dma.vmem_to_smem (!%p6481_p12), %s6485_s6, 16, %s6392_s8, [#allocation5]  }
  0x37   : > { %189 = sbr.rel (%p6985_p3) target bundleno = 2775 (0xad7), region = 36  ;;  %p6986_p4 = scmp.eq.s32.totalorder (!%p6985_p3), %s6442_s19, 0 }
  0x3e   : > { %6362 = dma.done.wait (%p6986_p4), [#allocation3], 9216   ;;  %p6987_p0 = pmov %p6986_p4 }
  0x40   : > { %6364 = vsyncadd (%p6987_p0), [#allocation3], 4294958080  ;;  %p6988_p7 = pmov %p6987_p0 }
  0x41   : > { %p6989_p8 = pmov %p6987_p0 }
  0x42   : > { %6366 = dma.done.wait (%p6988_p7), [#allocation5], 16  }
  0x43   : > { %6368 = vsyncadd (%p6989_p8), [#allocation5], 4294967280 }
  0x44   : > { %199 = sfence }
  0x45   : > { %p220_p11 = scmp.lt.s32.totalorder %s6442_s19, 1  ;;  %v6533_v0 = vld [vmem:[%s6975_s2] sm:$0xff]  ;;  %vm246_vm0 = vcmask 130048   ;;  %v6552_v4 = vld [vmem:[%s6975_s2 + $0x8] sm:$0xff]  ;;  %v6558_v5 = vld [vmem:[%s6975_s2 + $0x10] sm:$0xff]  ;;  %s5102_s9 = sld [smem:[#allocation6 + $0x1]] }
  0x46   : > { %5407 = vmatprep.mubr.msk.f32.mxu1 %vm246_vm0, %v6533_v0  ;;  %v6568_v6 = vld [vmem:[%s6975_s2 + $0x18] sm:$0xff]  ;;  %v6573_v7 = vld [vmem:[%s6975_s2 + $0x20] sm:$0xff]  ;;  %v6582_v8 = vld [vmem:[%s6975_s2 + $0x28] sm:$0xff]  ;;  %s217_s10 = sand.u32 1, %s6379_s16   ;;  %s5107_s13 = sld [smem:[#allocation6 + $0x2]]  ;;  %vm4758_vm1 = vcmask 261120  }
  0x47   : > { %s221_s27 = scalar_select %p220_p11, %s6442_s19, 1  ;;  %v6587_v9 = vld [vmem:[%s6975_s2 + $0x30] sm:$0xff]  ;;  %v6596_v10 = vld [vmem:[%s6975_s2 + $0x38] sm:$0xff]  ;;  %v647_v11 = vld [vmem:[#allocation2 + $0xc0] sm:$0xff] }
  0x48   : > { %v648_v12 = vld [vmem:[#allocation2 + $0xc8] sm:$0xff]  ;;  %v450_v14 = vld [vmem:[#allocation2 + $0x90] sm:$0xff]  ;;  %v451_v15 = vld [vmem:[#allocation2 + $0x98] sm:$0xff]  ;;  %s6207_s12 = smul.u32 96, %s217_s10  ;;  %p6990_p13 = scmp.ne.s32.totalorder %s6981_s25, 0 }
  0x49   : > { %s6208_s7 = smul.u32 48, %s221_s27  ;;  %v5899_v13 = vpack.c.bf16 %v648_v12, %v647_v11  ;;  %v5891_v16 = vpack.c.bf16 %v451_v15, %v450_v14  ;;  %v347_v17 = vld [vmem:[#allocation2 + $0x30] sm:$0xff]  ;;  %v348_v18 = vld [vmem:[#allocation2 + $0x38] sm:$0xff]  ;;  %v344_v20 = vld [vmem:[#allocation2] sm:$0xff]  ;;  %s6393_s8 = smov [#allocation7]  }
  0x4a   : > { %v5903_v19 = vpack.c.bf16 %v348_v18, %v347_v17  ;;  %v345_v21 = vld [vmem:[#allocation2 + $0x8] sm:$0xff]  ;;  %v820_v27 = vld [vmem:[#allocation2 + $0xf0] sm:$0xff]  ;;  %v821_v28 = vld [vmem:[#allocation2 + $0xf8] sm:$0xff]  ;;  %s6895_s14 = scalar_lea.vmem [#allocation7], %s6207_s12  ;;  %s6209_s20 = smul.u32 1536, %s6442_s19 }
  0x4b   : > { %s6541_s11 = scalar_lea.vmem %s6973_s0, %s6208_s7  ;;  %5892 = vmatprep.subr.bf16.mxu0 %v5891_v16  ;;  %v5895_v22 = vpack.c.bf16 %v345_v21, %v344_v20  ;;  %v5907_v31 = vpack.c.bf16 %v821_v28, %v820_v27  ;;  %v350_v34 = vld [vmem:[#allocation2 + $0x60] sm:$0xff]  ;;  %v351_v35 = vld [vmem:[#allocation2 + $0x68] sm:$0xff]  ;;  %v1194_v36 = vld [vmem:[#allocation2 + $0x150] sm:$0xff]  ;;  %s4799_s22 = sshll.u32 %s6895_s14, 4  ;;  %s6924_s22 = int_to_ptr.vmem [resolvable:$true] %s4799_s22 }
  0x4c   : > { %v244_v1 = vld [vmem:[%s6541_s11] sm:$0xff]  ;;  %v245_v2 = vld [vmem:[%s6541_s11 + $0x8] sm:$0xff]  ;;  %5894 = vmatpush3.bf16.msra.mxu0 %v5891_v16  ;;  %v1195_v37 = vld [vmem:[#allocation2 + $0x158] sm:$0xff]  ;;  %v5911_v38 = vpack.c.bf16 %v351_v35, %v350_v34  ;;  %s6922_s30 = scalar_lea.hbm %s6977_s4, %s6209_s20  ;;  %s6932_s19 = scalar_lea.sflag [#allocation4], %s217_s10 }
  0x4d   : > { %v6545_v3 = vpack.c.bf16 %v245_v2, %v244_v1  ;;  %5896 = vmatprep.subr.bf16.mxu0 %v5895_v22  ;;  %v5923_v39 = vpack.c.bf16 %v1195_v37, %v1194_v36  ;;  %v6619_v40 = vld [vmem:[%s6975_s2 + $0x40] sm:$0xff]  ;;  %v1091_v42 = vld [vmem:[#allocation2 + $0x128] sm:$0xff]  ;;  %v6634_v44 = vld [vmem:[%s6975_s2 + $0x50] sm:$0xff]  ;;  %s6317_s5 = scalar_lea.vmem %s6924_s22, 1536  ;;  %s6321_s29 = sshll.u32 %s6393_s8, 4  ;;  %s6322_s29 = int_to_ptr.vmem [resolvable:$false] %s6321_s29 }
  0x4e   : > { %v1090_v41 = vld [vmem:[#allocation2 + $0x120] sm:$0xff]  ;;  %v6629_v43 = vld [vmem:[%s6975_s2 + $0x48] sm:$0xff]  ;;  %v6645_v46 = vld [vmem:[%s6975_s2 + $0x58] sm:$0xff]  ;;  %p6318_p12 = scmp.ne.s32.totalorder %s6924_s22, %s6317_s5  ;;  %s6323_s6 = scalar_lea.vmem %s6322_s29, 3072 }
  0x4f   : > { %5884 = vmatprep.subr.bf16.mxu1 %v6545_v3  ;;  %v5919_v45 = vpack.c.bf16 %v1091_v42, %v1090_v41  ;;  %v1286_v47 = vld [vmem:[#allocation2 + $0x180] sm:$0xff]  ;;  %v1287_v48 = vld [vmem:[#allocation2 + $0x188] sm:$0xff]  ;;  %v1475_v52 = vld [vmem:[#allocation2 + $0x1b0] sm:$0xff]  ;;  %p6324_p5 = scmp.lt.s32.totalorder %s6924_s22, %s6322_s29  ;;  %p6325_p9 = scmp.lt.s32.totalorder %s6323_s6, %s6317_s5 }
  0x50   : > { %5886 = vmatpush3.bf16.msra.mxu1 %v6545_v3  ;;  %v5927_v49 = vpack.c.bf16 %v1287_v48, %v1286_v47  ;;  %v1579_v50 = vld [vmem:[#allocation2 + $0x1e0] sm:$0xff]  ;;  %v1580_v51 = vld [vmem:[#allocation2 + $0x1e8] sm:$0xff]  ;;  %v1476_v53 = vld [vmem:[#allocation2 + $0x1b8] sm:$0xff]  ;;  %p6319_p1 = pnand %p6318_p12, %p6990_p13 }
  0x51   : > { %5888 = vmatprep.subr.bf16.mxu1 %v6545_v3  ;;  %v5939_v56 = vpack.c.bf16 %v1580_v51, %v1579_v50  ;;  %v5935_v57 = vpack.c.bf16 %v1476_v53, %v1475_v52  ;;  %v6663_v60 = vld [vmem:[%s6975_s2 + $0x60] sm:$0xff]  ;;  %v6675_v61 = vld [vmem:[%s6975_s2 + $0x68] sm:$0xff]  ;;  %v6680_v62 = vld [vmem:[%s6975_s2 + $0x70] sm:$0xff]  ;;  %p6326_p10 = por %p6325_p9, %p6324_p5 }
  0x52   : > { %v6691_v63 = vld [vmem:[%s6975_s2 + $0x78] sm:$0xff]  ;;  %v4970_v1 = vld [vmem:[%s6541_s11 + $0x10] sm:$0xff]  ;;  %v1955_v14 = vld [vmem:[#allocation2 + $0x40] sm:$0xff]  ;;  %p6320_p6 = pneg %p6319_p1 }
  0x53   : > { %5408 = vmatmul.mubr.msk.f32.vlgmr.msra.gmra.mrb[0].mxu1 %vm246_vm0, %v6552_v4  ;;  %v4971_v2 = vld [vmem:[%s6541_s11 + $0x18] sm:$0xff]  ;;  %v1671_v11 = vld [vmem:[#allocation2 + $0x210] sm:$0xff]  ;;  %v1956_v15 = vld [vmem:[#allocation2 + $0x48] sm:$0xff] }
  0x54   : > { %5890 = vmatpush3.bf16.msra.mxu1 %v6545_v3  ;;  %5410 = vmatprep.mubr.msk.f32.mxu1 %vm246_vm0, %v6558_v5  ;;  %v1672_v12 = vld [vmem:[#allocation2 + $0x218] sm:$0xff]  ;;  %v1851_v16 = vld [vmem:[#allocation2 + $0x10] sm:$0xff]  ;;  %v5955_v20 = vpack.c.bf16 %v1956_v15, %v1955_v14  ;;  %v2420_v37 = vld [vmem:[#allocation2 + $0x100] sm:$0xff]  ;;  %p6327_p2 = pnand %p6326_p10, %p6320_p6 }
  0x55   : > { %5900 = vmatprep.subr.bf16.mxu1 %v5899_v13  ;;  %v1852_v17 = vld [vmem:[#allocation2 + $0x18] sm:$0xff]  ;;  %v2328_v27 = vld [vmem:[#allocation2 + $0xd0] sm:$0xff]  ;;  %v2701_v41 = vld [vmem:[#allocation2 + $0x160] sm:$0xff] }
  0x56   : > { %v5951_v21 = vpack.c.bf16 %v1852_v17, %v1851_v16  ;;  %v2329_v28 = vld [vmem:[#allocation2 + $0xd8] sm:$0xff]  ;;  %v2702_v42 = vld [vmem:[#allocation2 + $0x168] sm:$0xff] }
  0x57   : > { %5411 = vmatmul.mubr.msk.f32.gmra.mrb[2].mxu1 %vm246_vm0, %v6568_v6  ;;  %v2598_v47 = vld [vmem:[#allocation2 + $0x138] sm:$0xff]  ;;  %v5987_v50 = vpack.c.bf16 %v2702_v42, %v2701_v41  ;;  %v5037_v16 = vld [vmem:[%s6541_s11 + $0x28] sm:$0xff] }
  0x58   : > { %5417 = vmatprep.mubr.msk.f32.mxu1 %vm246_vm0, %v6573_v7  ;;  %v3916_v41 = vld [vmem:[#allocation2 + $0x118] sm:$0xff] }
  0x5b   : > { %5418 = vmatmul.mubr.msk.f32.vlgmr.msra.gmra.mrb[4].mxu1 %vm246_vm0, %v6582_v8 }
  0x5c   : > { %5420 = vmatprep.mubr.msk.f32.mxu1 %vm246_vm0, %v6587_v9  ;;  %5902 = vmatpush3.bf16.msra.mxu1 %v5899_v13  ;;  %v5943_v13 = vpack.c.bf16 %v1672_v12, %v1671_v11 }
  0x5d   : > { %5904 = vmatprep.subr.bf16.mxu1 %v5903_v19 }
  0x5f   : > { %5421 = vmatmul.mubr.msk.f32.gmra.mrb[6].mxu1 %vm246_vm0, %v6596_v10 }
 0x126   : > { %v5409_v23 = vpop.f32.mrb[0].mxu1 }
 0x127   : > { %v325_v24 = vpop.f32.mrb[1].mxu1 }
 0x12a   : > { %v5412_v25 = vpop.f32.mrb[2].mxu1 }
 0x12b   : > { %v335_v26 = vpop.f32.mrb[3].mxu1 }
 0x12e   : > { %v5419_v29 = vpop.f32.mrb[4].mxu1 }
 0x12f   : > { %v430_v30 = vpop.f32.mrb[5].mxu1 }
 0x130   : > { %5427 = vmatprep.mubr.msk.f32.mxu0 %vm246_vm0, %v430_v30  ;;  %5447 = vmatprep.mubr.msk.f32.mxu1 %vm246_vm0, %v430_v30 }
 0x131   : > { %5428 = vmatmul.mubr.msk.f32.vlgmr.msra.gmra.mrb[0].mxu0 %vm246_vm0, %v5419_v29  ;;  %5448 = vmatmul.mubr.msk.f32.vlgmr.msra.gmra.mrb[8].mxu1 %vm246_vm0, %v5419_v29 }
 0x132   : > { %v5422_v32 = vpop.f32.mrb[6].mxu1  ;;  %5906 = vmatpush3.bf16.msra.mxu1 %v5903_v19  ;;  %5898 = vmatpush3.bf16.msra.mxu0 %v5895_v22 }
 0x133   : > { %v440_v33 = vpop.f32.mrb[7].mxu1  ;;  %5916 = vmatprep.subr.bf16.mxu1 %v6545_v3  ;;  %5908 = vmatprep.subr.bf16.mxu0 %v5907_v31 }
 0x134   : > { %5430 = vmatprep.mubr.msk.f32.mxu0 %vm246_vm0, %v440_v33  ;;  %5450 = vmatprep.mubr.msk.f32.mxu1 %vm246_vm0, %v440_v33 }
 0x135   : > { %5431 = vmatmul.mubr.msk.f32.gmra.mrb[2].mxu0 %vm246_vm0, %v5422_v32  ;;  %5451 = vmatmul.mubr.msk.f32.gmra.mrb[10].mxu1 %vm246_vm0, %v5422_v32 }
 0x136   : > { %5437 = vmatprep.mubr.msk.f32.mxu0 %vm246_vm0, %v325_v24  ;;  %5457 = vmatprep.mubr.msk.f32.mxu1 %vm246_vm0, %v325_v24 }
 0x139   : > { %5438 = vmatmul.mubr.msk.f32.vlgmr.msra.gmra.mrb[0].mxu0 %vm246_vm0, %v5409_v23  ;;  %5458 = vmatmul.mubr.msk.f32.vlgmr.msra.gmra.mrb[8].mxu1 %vm246_vm0, %v5409_v23 }
 0x13a   : > { %5440 = vmatprep.mubr.msk.f32.mxu0 %vm246_vm0, %v335_v26  ;;  %5460 = vmatprep.mubr.msk.f32.mxu1 %vm246_vm0, %v335_v26 }
 0x13b   : > { %5918 = vmatpush3.bf16.msra.mxu1 %v6545_v3  ;;  %5910 = vmatpush3.bf16.msra.mxu0 %v5907_v31 }
 0x13c   : > { %5912 = vmatprep.subr.bf16.mxu0 %v5911_v38  ;;  %5924 = vmatprep.subr.bf16.mxu1 %v5923_v39 }
 0x13d   : > { %5441 = vmatmul.mubr.msk.f32.gmra.mrb[2].mxu0 %vm246_vm0, %v5412_v25  ;;  %5461 = vmatmul.mubr.msk.f32.gmra.mrb[10].mxu1 %vm246_vm0, %v5412_v25 }
 0x13e   : > { %5467 = vmatprep.mubr.msk.f32.mxu0 %vm246_vm0, %v430_v30  ;;  %5487 = vmatprep.mubr.msk.f32.mxu1 %vm246_vm0, %v6619_v40  ;;  %v2225_v30 = vld [vmem:[#allocation2 + $0xa8] sm:$0xff] }
 0x141   : > { %5468 = vmatmul.mubr.msk.f32.vlgmr.msra.gmra.mrb[4].mxu0 %vm246_vm0, %v5419_v29  ;;  %5488 = vmatmul.mubr.msk.f32.vlgmr.msra.gmra.mrb[12].mxu1 %vm246_vm0, %v6629_v43  ;;  %v2224_v29 = vld [vmem:[#allocation2 + $0xa0] sm:$0xff] }
 0x142   : > { %5470 = vmatprep.mubr.msk.f32.mxu0 %vm246_vm0, %v440_v33  ;;  %5490 = vmatprep.mubr.msk.f32.mxu1 %vm246_vm0, %v6634_v44  ;;  %v5971_v33 = vpack.c.bf16 %v2329_v28, %v2328_v27  ;;  %v5967_v34 = vpack.c.bf16 %v2225_v30, %v2224_v29 }
 0x143   : > { %5914 = vmatpush3.bf16.msra.mxu0 %v5911_v38  ;;  %5926 = vmatpush3.bf16.msra.mxu1 %v5923_v39  ;;  %v2421_v38 = vld [vmem:[#allocation2 + $0x108] sm:$0xff] }
 0x144   : > { %5920 = vmatprep.subr.bf16.mxu0 %v5919_v45  ;;  %5932 = vmatprep.subr.bf16.mxu1 %v6545_v3  ;;  %v5975_v39 = vpack.c.bf16 %v2421_v38, %v2420_v37 }
 0x145   : > { %5471 = vmatmul.mubr.msk.f32.gmra.mrb[6].mxu0 %vm246_vm0, %v5422_v32  ;;  %5491 = vmatmul.mubr.msk.f32.gmra.mrb[14].mxu1 %vm246_vm0, %v6645_v46 }
 0x146   : > { %5477 = vmatprep.mubr.msk.f32.mxu0 %vm246_vm0, %v325_v24  ;;  %v2047_v24 = vld [vmem:[#allocation2 + $0x70] sm:$0xff] }
 0x149   : > { %5478 = vmatmul.mubr.msk.f32.vlgmr.msra.gmra.mrb[4].mxu0 %vm246_vm0, %v5409_v23 }
 0x14a   : > { %5480 = vmatprep.mubr.msk.f32.mxu0 %vm246_vm0, %v335_v26  ;;  %5922 = vmatpush3.bf16.msra.mxu0 %v5919_v45  ;;  %v2597_v45 = vld [vmem:[#allocation2 + $0x130] sm:$0xff] }
 0x14b   : > { %5928 = vmatprep.subr.bf16.mxu0 %v5927_v49  ;;  %v5983_v51 = vpack.c.bf16 %v2598_v47, %v2597_v45  ;;  %v4196_v45 = vld [vmem:[#allocation2 + $0x170] sm:$0xff]  ;;  %v4092_v47 = vld [vmem:[#allocation2 + $0x140] sm:$0xff] }
 0x14d   : > { %5481 = vmatmul.mubr.msk.f32.gmra.mrb[6].mxu0 %vm246_vm0, %v5412_v25  ;;  %v2048_v25 = vld [vmem:[#allocation2 + $0x78] sm:$0xff] }
 0x14e   : > { %v5959_v26 = vpack.c.bf16 %v2048_v25, %v2047_v24  ;;  %v3347_v24 = vld [vmem:[#allocation2 + $0x28] sm:$0xff] }
 0x214   : > { %v5489_v54 = vpop.f32.mrb[12].mxu1 }
 0x215   : > { %v1070_v55 = vpop.f32.mrb[13].mxu1 }
 0x216   : > { %5497 = vmatprep.mubr.msk.f32.mxu0 %vm246_vm0, %v1070_v55  ;;  %5507 = vmatprep.mubr.msk.f32.mxu1 %vm246_vm0, %v1070_v55 }
 0x217   : > { %5498 = vmatmul.mubr.msk.f32.vlgmr.msra.gmra.mrb[0].mxu0 %vm246_vm0, %v5489_v54  ;;  %5508 = vmatmul.mubr.msk.f32.vlgmr.msra.gmra.mrb[8].mxu1 %vm246_vm0, %v5489_v54 }
 0x218   : > { %v5492_v58 = vpop.f32.mrb[14].mxu1  ;;  %5934 = vmatpush3.bf16.msra.mxu1 %v6545_v3  ;;  %5930 = vmatpush3.bf16.msra.mxu0 %v5927_v49  ;;  %v6698_v3 = vpack.c.bf16 %v4971_v2, %v4970_v1  ;;  %v2971_v1 = vld [vmem:[#allocation2 + $0x1c8] sm:$0xff] }
 0x219   : > { %v1080_v59 = vpop.f32.mrb[15].mxu1  ;;  %5940 = vmatprep.subr.bf16.mxu1 %v5939_v56  ;;  %5936 = vmatprep.subr.bf16.mxu0 %v5935_v57 }
 0x21a   : > { %5500 = vmatprep.mubr.msk.f32.mxu0 %vm246_vm0, %v1080_v59  ;;  %5510 = vmatprep.mubr.msk.f32.mxu1 %vm246_vm0, %v1080_v59 }
 0x21b   : > { %5501 = vmatmul.mubr.msk.f32.gmra.mrb[2].mxu0 %vm246_vm0, %v5492_v58  ;;  %5511 = vmatmul.mubr.msk.f32.gmra.mrb[10].mxu1 %vm246_vm0, %v5492_v58 }
 0x21c   : > { %5517 = vmatprep.mubr.msk.f32.mxu0 %vm246_vm0, %v1070_v55  ;;  %5527 = vmatprep.mubr.msk.f32.mxu1 %vm246_vm0, %v6663_v60  ;;  %v2794_v55 = vld [vmem:[#allocation2 + $0x198] sm:$0xff] }
 0x21f   : > { %5518 = vmatmul.mubr.msk.f32.vlgmr.msra.gmra.mrb[4].mxu0 %vm246_vm0, %v5489_v54  ;;  %5528 = vmatmul.mubr.msk.f32.vlgmr.msra.gmra.mrb[16].mxu1 %vm246_vm0, %v6675_v61  ;;  %v2793_v54 = vld [vmem:[#allocation2 + $0x190] sm:$0xff] }
 0x220   : > { %5520 = vmatprep.mubr.msk.f32.mxu0 %vm246_vm0, %v1080_v59  ;;  %5530 = vmatprep.mubr.msk.f32.mxu1 %vm246_vm0, %v6680_v62  ;;  %v2970_v59 = vld [vmem:[#allocation2 + $0x1c0] sm:$0xff] }
 0x221   : > { %5942 = vmatpush3.bf16.msra.mxu1 %v5939_v56  ;;  %5938 = vmatpush3.bf16.msra.mxu0 %v5935_v57  ;;  %v5991_v56 = vpack.c.bf16 %v2794_v55, %v2793_v54  ;;  %v3074_v57 = vld [vmem:[#allocation2 + $0x1f0] sm:$0xff] }
 0x222   : > { %5948 = vmatprep.subr.bf16.mxu1 %v6698_v3  ;;  %5944 = vmatprep.subr.bf16.mxu0 %v5943_v13  ;;  %v4465_v55 = vld [vmem:[#allocation2 + $0x1d0] sm:$0xff] }
 0x223   : > { %5521 = vmatmul.mubr.msk.f32.gmra.mrb[6].mxu0 %vm246_vm0, %v5492_v58  ;;  %5531 = vmatmul.mubr.msk.f32.gmra.mrb[18].mxu1 %vm246_vm0, %v6691_v63  ;;  %v3075_v58 = vld [vmem:[#allocation2 + $0x1f8] sm:$0xff] }
 0x224   : > { %v6003_v12 = vpack.c.bf16 %v3075_v58, %v3074_v57  ;;  %v4570_v57 = vld [vmem:[#allocation2 + $0x208] sm:$0xff] }
 0x2f2   : > { %v5529_v18 = vpop.f32.mrb[16].mxu1 }
 0x2f3   : > { %v1455_v19 = vpop.f32.mrb[17].mxu1 }
 0x2f4   : > { %5537 = vmatprep.mubr.msk.f32.mxu0 %vm246_vm0, %v1455_v19  ;;  %5547 = vmatprep.mubr.msk.f32.mxu1 %vm246_vm0, %v1455_v19 }
 0x2f5   : > { %5538 = vmatmul.mubr.msk.f32.vlgmr.msra.gmra.mrb[0].mxu0 %vm246_vm0, %v5529_v18  ;;  %5548 = vmatmul.mubr.msk.f32.vlgmr.msra.gmra.mrb[8].mxu1 %vm246_vm0, %v5529_v18 }
 0x2f6   : > { %v5532_v22 = vpop.f32.mrb[18].mxu1  ;;  %5950 = vmatpush3.bf16.msra.mxu1 %v6698_v3  ;;  %5946 = vmatpush3.bf16.msra.mxu0 %v5943_v13  ;;  %v5999_v13 = vpack.c.bf16 %v2971_v1, %v2970_v59 }
 0x2f7   : > { %v1465_v23 = vpop.f32.mrb[19].mxu1  ;;  %5956 = vmatprep.subr.bf16.mxu1 %v5955_v20  ;;  %5952 = vmatprep.subr.bf16.mxu0 %v5951_v21 }
 0x2f8   : > { %5540 = vmatprep.mubr.msk.f32.mxu0 %vm246_vm0, %v1465_v23  ;;  %5550 = vmatprep.mubr.msk.f32.mxu1 %vm246_vm0, %v1465_v23 }
 0x2f9   : > { %5541 = vmatmul.mubr.msk.f32.gmra.mrb[2].mxu0 %vm246_vm0, %v5532_v22  ;;  %5551 = vmatmul.mubr.msk.f32.gmra.mrb[10].mxu1 %vm246_vm0, %v5532_v22 }
 0x2fa   : > { %5557 = vmatprep.mubr.msk.f32.mxu0 %vm246_vm0, %v1455_v19  ;;  %5567 = vmatprep.mubr.msk.f32.mxu1 %vm246_vm0, %v6533_v0  ;;  %v3167_v19 = vld [vmem:[#allocation2 + $0x228] sm:$0xff] }
 0x2fd   : > { %5558 = vmatmul.mubr.msk.f32.vlgmr.msra.gmra.mrb[4].mxu0 %vm246_vm0, %v5529_v18  ;;  %5568 = vmatmul.mubr.msk.f32.vlgmr.msra.gmra.mrb[20].mxu1 %vm246_vm0, %v6552_v4  ;;  %v3166_v18 = vld [vmem:[#allocation2 + $0x220] sm:$0xff] }
 0x2fe   : > { %5560 = vmatprep.mubr.msk.f32.mxu0 %vm246_vm0, %v1465_v23  ;;  %5570 = vmatprep.mubr.msk.f32.mxu1 %vm246_vm0, %v6558_v5  ;;  %v3346_v23 = vld [vmem:[#allocation2 + $0x20] sm:$0xff] }
 0x2ff   : > { %5958 = vmatpush3.bf16.msra.mxu1 %v5955_v20  ;;  %5954 = vmatpush3.bf16.msra.mxu0 %v5951_v21  ;;  %v6007_v20 = vpack.c.bf16 %v3167_v19, %v3166_v18  ;;  %v3450_v21 = vld [vmem:[#allocation2 + $0x50] sm:$0xff]  ;;  %v6015_v28 = vpack.c.bf16 %v3347_v24, %v3346_v23 }
 0x300   : > { %5964 = vmatprep.subr.bf16.mxu1 %v6698_v3  ;;  %5960 = vmatprep.subr.bf16.mxu0 %v5959_v26 }
 0x301   : > { %5561 = vmatmul.mubr.msk.f32.gmra.mrb[6].mxu0 %vm246_vm0, %v5532_v22  ;;  %5571 = vmatmul.mubr.msk.f32.gmra.mrb[22].mxu1 %vm246_vm0, %v6568_v6  ;;  %v3451_v22 = vld [vmem:[#allocation2 + $0x58] sm:$0xff] }
 0x302   : > { %v6019_v27 = vpack.c.bf16 %v3451_v22, %v3450_v21 }
 0x3d0   : > { %v5569_v31 = vpop.f32.mrb[20].mxu1 }
 0x3d1   : > { %v1831_v32 = vpop.f32.mrb[21].mxu1 }
 0x3d2   : > { %5577 = vmatprep.mubr.msk.f32.mxu0 %vm246_vm0, %v1831_v32  ;;  %5587 = vmatprep.mubr.msk.f32.mxu1 %vm246_vm0, %v1831_v32 }
 0x3d3   : > { %5578 = vmatmul.mubr.msk.f32.vlgmr.msra.gmra.mrb[0].mxu0 %vm246_vm0, %v5569_v31  ;;  %5588 = vmatmul.mubr.msk.f32.vlgmr.msra.gmra.mrb[8].mxu1 %vm246_vm0, %v5569_v31 }
 0x3d4   : > { %v5572_v35 = vpop.f32.mrb[22].mxu1  ;;  %5966 = vmatpush3.bf16.msra.mxu1 %v6698_v3  ;;  %5962 = vmatpush3.bf16.msra.mxu0 %v5959_v26 }
 0x3d5   : > { %v1841_v36 = vpop.f32.mrb[23].mxu1  ;;  %5972 = vmatprep.subr.bf16.mxu1 %v5971_v33  ;;  %5968 = vmatprep.subr.bf16.mxu0 %v5967_v34 }
 0x3d6   : > { %5580 = vmatprep.mubr.msk.f32.mxu0 %vm246_vm0, %v1841_v36  ;;  %5590 = vmatprep.mubr.msk.f32.mxu1 %vm246_vm0, %v1841_v36 }
 0x3d7   : > { %5581 = vmatmul.mubr.msk.f32.gmra.mrb[2].mxu0 %vm246_vm0, %v5572_v35  ;;  %5591 = vmatmul.mubr.msk.f32.gmra.mrb[10].mxu1 %vm246_vm0, %v5572_v35 }
 0x3d8   : > { %5597 = vmatprep.mubr.msk.f32.mxu0 %vm246_vm0, %v1831_v32  ;;  %5607 = vmatprep.mubr.msk.f32.mxu1 %vm246_vm0, %v6573_v7 }
 0x3db   : > { %5598 = vmatmul.mubr.msk.f32.vlgmr.msra.gmra.mrb[4].mxu0 %vm246_vm0, %v5569_v31  ;;  %5608 = vmatmul.mubr.msk.f32.vlgmr.msra.gmra.mrb[24].mxu1 %vm246_vm0, %v6582_v8  ;;  %v3543_v31 = vld [vmem:[#allocation2 + $0x88] sm:$0xff] }
 0x3dc   : > { %5600 = vmatprep.mubr.msk.f32.mxu0 %vm246_vm0, %v1841_v36  ;;  %5610 = vmatprep.mubr.msk.f32.mxu1 %vm246_vm0, %v6587_v9 }
 0x3dd   : > { %5974 = vmatpush3.bf16.msra.mxu1 %v5971_v33  ;;  %5970 = vmatpush3.bf16.msra.mxu0 %v5967_v34  ;;  %v3823_v33 = vld [vmem:[#allocation2 + $0xe0] sm:$0xff]  ;;  %v3719_v34 = vld [vmem:[#allocation2 + $0xb0] sm:$0xff] }
 0x3de   : > { %5980 = vmatprep.subr.bf16.mxu1 %v6698_v3  ;;  %5976 = vmatprep.subr.bf16.mxu0 %v5975_v39 }
 0x3df   : > { %5601 = vmatmul.mubr.msk.f32.gmra.mrb[6].mxu0 %vm246_vm0, %v5572_v35  ;;  %5611 = vmatmul.mubr.msk.f32.gmra.mrb[26].mxu1 %vm246_vm0, %v6596_v10  ;;  %v3720_v35 = vld [vmem:[#allocation2 + $0xb8] sm:$0xff] }
 0x3e0   : > { %v6031_v38 = vpack.c.bf16 %v3720_v35, %v3719_v34 }
 0x4ae   : > { %v5609_v48 = vpop.f32.mrb[24].mxu1 }
 0x4af   : > { %v2204_v49 = vpop.f32.mrb[25].mxu1 }
 0x4b0   : > { %5617 = vmatprep.mubr.msk.f32.mxu0 %vm246_vm0, %v2204_v49  ;;  %5627 = vmatprep.mubr.msk.f32.mxu1 %vm246_vm0, %v2204_v49 }
 0x4b1   : > { %5618 = vmatmul.mubr.msk.f32.vlgmr.msra.gmra.mrb[0].mxu0 %vm246_vm0, %v5609_v48  ;;  %5628 = vmatmul.mubr.msk.f32.vlgmr.msra.gmra.mrb[8].mxu1 %vm246_vm0, %v5609_v48 }
 0x4b2   : > { %v5612_v52 = vpop.f32.mrb[26].mxu1  ;;  %5982 = vmatpush3.bf16.msra.mxu1 %v6698_v3  ;;  %5978 = vmatpush3.bf16.msra.mxu0 %v5975_v39 }
 0x4b3   : > { %v2214_v53 = vpop.f32.mrb[27].mxu1  ;;  %5988 = vmatprep.subr.bf16.mxu1 %v5987_v50  ;;  %5984 = vmatprep.subr.bf16.mxu0 %v5983_v51 }
 0x4b4   : > { %5620 = vmatprep.mubr.msk.f32.mxu0 %vm246_vm0, %v2214_v53  ;;  %5630 = vmatprep.mubr.msk.f32.mxu1 %vm246_vm0, %v2214_v53 }
 0x4b5   : > { %5621 = vmatmul.mubr.msk.f32.gmra.mrb[2].mxu0 %vm246_vm0, %v5612_v52  ;;  %5631 = vmatmul.mubr.msk.f32.gmra.mrb[10].mxu1 %vm246_vm0, %v5612_v52 }
 0x4b6   : > { %5637 = vmatprep.mubr.msk.f32.mxu0 %vm246_vm0, %v2204_v49  ;;  %5647 = vmatprep.mubr.msk.f32.mxu1 %vm246_vm0, %v6619_v40 }
 0x4b9   : > { %5638 = vmatmul.mubr.msk.f32.vlgmr.msra.gmra.mrb[4].mxu0 %vm246_vm0, %v5609_v48  ;;  %5648 = vmatmul.mubr.msk.f32.vlgmr.msra.gmra.mrb[28].mxu1 %vm246_vm0, %v6629_v43  ;;  %v4093_v48 = vld [vmem:[#allocation2 + $0x148] sm:$0xff] }
 0x4ba   : > { %5640 = vmatprep.mubr.msk.f32.mxu0 %vm246_vm0, %v2214_v53  ;;  %5650 = vmatprep.mubr.msk.f32.mxu1 %vm246_vm0, %v6634_v44  ;;  %v4289_v53 = vld [vmem:[#allocation2 + $0x1a8] sm:$0xff] }
 0x4bb   : > { %5990 = vmatpush3.bf16.msra.mxu1 %v5987_v50  ;;  %5986 = vmatpush3.bf16.msra.mxu0 %v5983_v51  ;;  %v6047_v51 = vpack.c.bf16 %v4093_v48, %v4092_v47 }
 0x4bc   : > { %5996 = vmatprep.subr.bf16.mxu1 %v6698_v3  ;;  %5992 = vmatprep.subr.bf16.mxu0 %v5991_v56 }
 0x4bd   : > { %5641 = vmatmul.mubr.msk.f32.gmra.mrb[6].mxu0 %vm246_vm0, %v5612_v52  ;;  %5651 = vmatmul.mubr.msk.f32.gmra.mrb[30].mxu1 %vm246_vm0, %v6645_v46 }
 0x58c   : > { %v5649_v2 = vpop.f32.mrb[28].mxu1 }
 0x58d   : > { %v2577_v11 = vpop.f32.mrb[29].mxu1 }
 0x58e   : > { %5657 = vmatprep.mubr.msk.f32.mxu0 %vm246_vm0, %v2577_v11  ;;  %5667 = vmatprep.mubr.msk.f32.mxu1 %vm246_vm0, %v2577_v11 }
 0x58f   : > { %5658 = vmatmul.mubr.msk.f32.vlgmr.msra.gmra.mrb[0].mxu0 %vm246_vm0, %v5649_v2  ;;  %5668 = vmatmul.mubr.msk.f32.vlgmr.msra.gmra.mrb[8].mxu1 %vm246_vm0, %v5649_v2 }
 0x590   : > { %v5652_v14 = vpop.f32.mrb[30].mxu1  ;;  %5998 = vmatpush3.bf16.msra.mxu1 %v6698_v3  ;;  %5994 = vmatpush3.bf16.msra.mxu0 %v5991_v56  ;;  %v5036_v3 = vld [vmem:[%s6541_s11 + $0x20] sm:$0xff]  ;;  %s4752_s11 = sld [smem:[#allocation6]] }
 0x591   : > { %v2587_v15 = vpop.f32.mrb[31].mxu1  ;;  %6004 = vmatprep.subr.bf16.mxu1 %v6003_v12  ;;  %6000 = vmatprep.subr.bf16.mxu0 %v5999_v13  ;;  %v6790_v17 = vpack.c.bf16 %v5037_v16, %v5036_v3  ;;  %v4569_v56 = vld [vmem:[#allocation2 + $0x200] sm:$0xff] }
 0x592   : > { %5660 = vmatprep.mubr.msk.f32.mxu0 %vm246_vm0, %v2587_v15  ;;  %5670 = vmatprep.mubr.msk.f32.mxu1 %vm246_vm0, %v2587_v15  ;;  %v6067_v1 = vpack.c.bf16 %v4570_v57, %v4569_v56 }
 0x593   : > { %5661 = vmatmul.mubr.msk.f32.gmra.mrb[2].mxu0 %vm246_vm0, %v5652_v14  ;;  %5671 = vmatmul.mubr.msk.f32.gmra.mrb[10].mxu1 %vm246_vm0, %v5652_v14 }
 0x594   : > { %5677 = vmatprep.mubr.msk.f32.mxu0 %vm246_vm0, %v2577_v11  ;;  %5687 = vmatprep.mubr.msk.f32.mxu1 %vm246_vm0, %v6663_v60  ;;  %v4661_v11 = vld [vmem:[#allocation2 + $0x230] sm:$0xff] }
 0x597   : > { %5678 = vmatmul.mubr.msk.f32.vlgmr.msra.gmra.mrb[4].mxu0 %vm246_vm0, %v5649_v2  ;;  %5688 = vmatmul.mubr.msk.f32.vlgmr.msra.gmra.mrb[32].mxu1 %vm246_vm0, %v6675_v61 }
 0x598   : > { %5680 = vmatprep.mubr.msk.f32.mxu0 %vm246_vm0, %v2587_v15  ;;  %5690 = vmatprep.mubr.msk.f32.mxu1 %vm246_vm0, %v6680_v62  ;;  %v4764_v15 = vstv %s5102_s9 }
 0x599   : > { %6006 = vmatpush3.bf16.msra.mxu1 %v6003_v12  ;;  %6002 = vmatpush3.bf16.msra.mxu0 %v5999_v13  ;;  %v4662_v12 = vld [vmem:[#allocation2 + $0x238] sm:$0xff] }
 0x59a   : > { %6012 = vmatprep.subr.bf16.mxu1 %v6790_v17  ;;  %6008 = vmatprep.subr.bf16.mxu0 %v6007_v20 }
 0x59b   : > { %5681 = vmatmul.mubr.msk.f32.gmra.mrb[6].mxu0 %vm246_vm0, %v5652_v14  ;;  %5691 = vmatmul.mubr.msk.f32.gmra.mrb[34].mxu1 %vm246_vm0, %v6691_v63 }
 0x66a   : > { %v5689_v25 = vpop.f32.mrb[32].mxu1 }
 0x66b   : > { %v2950_v26 = vpop.f32.mrb[33].mxu1 }
 0x66c   : > { %5697 = vmatprep.mubr.msk.f32.mxu0 %vm246_vm0, %v2950_v26  ;;  %5707 = vmatprep.mubr.msk.f32.mxu1 %vm246_vm0, %v2950_v26 }
 0x66d   : > { %5698 = vmatmul.mubr.msk.f32.vlgmr.msra.gmra.mrb[0].mxu0 %vm246_vm0, %v5689_v25  ;;  %5708 = vmatmul.mubr.msk.f32.vlgmr.msra.gmra.mrb[8].mxu1 %vm246_vm0, %v5689_v25 }
 0x66e   : > { %v5692_v29 = vpop.f32.mrb[34].mxu1  ;;  %6014 = vmatpush3.bf16.msra.mxu1 %v6790_v17  ;;  %6010 = vmatpush3.bf16.msra.mxu0 %v6007_v20 }
 0x66f   : > { %v2960_v30 = vpop.f32.mrb[35].mxu1  ;;  %6020 = vmatprep.subr.bf16.mxu1 %v6019_v27  ;;  %6016 = vmatprep.subr.bf16.mxu0 %v6015_v28 }
 0x670   : > { %5700 = vmatprep.mubr.msk.f32.mxu0 %vm246_vm0, %v2960_v30  ;;  %5710 = vmatprep.mubr.msk.f32.mxu1 %vm246_vm0, %v2960_v30 }
 0x671   : > { %5701 = vmatmul.mubr.msk.f32.gmra.mrb[2].mxu0 %vm246_vm0, %v5692_v29  ;;  %5711 = vmatmul.mubr.msk.f32.gmra.mrb[10].mxu1 %vm246_vm0, %v5692_v29 }
 0x672   : > { %5717 = vmatprep.mubr.msk.f32.mxu0 %vm246_vm0, %v2950_v26  ;;  %5727 = vmatprep.mubr.msk.f32.mxu1 %vm246_vm0, %v6533_v0  ;;  %v3542_v0 = vld [vmem:[#allocation2 + $0x80] sm:$0xff] }
 0x673   : > { %v6023_v32 = vpack.c.bf16 %v3543_v31, %v3542_v0  ;;  %v4775_v0 = vstv %s5107_s13 }
 0x675   : > { %5718 = vmatmul.mubr.msk.f32.vlgmr.msra.gmra.mrb[4].mxu0 %vm246_vm0, %v5689_v25  ;;  %5728 = vmatmul.mubr.msk.f32.vlgmr.msra.gmra.mrb[36].mxu1 %vm246_vm0, %v6552_v4  ;;  %v3824_v4 = vld [vmem:[#allocation2 + $0xe8] sm:$0xff] }
 0x676   : > { %5720 = vmatprep.mubr.msk.f32.mxu0 %vm246_vm0, %v2960_v30  ;;  %5730 = vmatprep.mubr.msk.f32.mxu1 %vm246_vm0, %v6558_v5  ;;  %v6035_v5 = vpack.c.bf16 %v3824_v4, %v3823_v33 }
 0x677   : > { %6022 = vmatpush3.bf16.msra.mxu1 %v6019_v27  ;;  %6018 = vmatpush3.bf16.msra.mxu0 %v6015_v28 }
 0x678   : > { %6028 = vmatprep.subr.bf16.mxu1 %v6790_v17  ;;  %6024 = vmatprep.subr.bf16.mxu0 %v6023_v32 }
 0x679   : > { %5721 = vmatmul.mubr.msk.f32.gmra.mrb[6].mxu0 %vm246_vm0, %v5692_v29  ;;  %5731 = vmatmul.mubr.msk.f32.gmra.mrb[38].mxu1 %vm246_vm0, %v6568_v6 }
 0x748   : > { %v5729_v36 = vpop.f32.mrb[36].mxu1 }
 0x749   : > { %v3326_v37 = vpop.f32.mrb[37].mxu1 }
 0x74a   : > { %5737 = vmatprep.mubr.msk.f32.mxu0 %vm246_vm0, %v3326_v37  ;;  %5747 = vmatprep.mubr.msk.f32.mxu1 %vm246_vm0, %v3326_v37 }
 0x74b   : > { %5738 = vmatmul.mubr.msk.f32.vlgmr.msra.gmra.mrb[0].mxu0 %vm246_vm0, %v5729_v36  ;;  %5748 = vmatmul.mubr.msk.f32.vlgmr.msra.gmra.mrb[8].mxu1 %vm246_vm0, %v5729_v36 }
 0x74c   : > { %v5732_v6 = vpop.f32.mrb[38].mxu1  ;;  %6030 = vmatpush3.bf16.msra.mxu1 %v6790_v17  ;;  %6026 = vmatpush3.bf16.msra.mxu0 %v6023_v32 }
 0x74d   : > { %v3336_v39 = vpop.f32.mrb[39].mxu1  ;;  %6036 = vmatprep.subr.bf16.mxu1 %v6035_v5  ;;  %6032 = vmatprep.subr.bf16.mxu0 %v6031_v38 }
 0x74e   : > { %5740 = vmatprep.mubr.msk.f32.mxu0 %vm246_vm0, %v3336_v39  ;;  %5750 = vmatprep.mubr.msk.f32.mxu1 %vm246_vm0, %v3336_v39 }
 0x74f   : > { %5741 = vmatmul.mubr.msk.f32.gmra.mrb[2].mxu0 %vm246_vm0, %v5732_v6  ;;  %5751 = vmatmul.mubr.msk.f32.gmra.mrb[10].mxu1 %vm246_vm0, %v5732_v6 }
 0x750   : > { %5757 = vmatprep.mubr.msk.f32.mxu0 %vm246_vm0, %v3326_v37  ;;  %5767 = vmatprep.mubr.msk.f32.mxu1 %vm246_vm0, %v6573_v7  ;;  %v3915_v7 = vld [vmem:[#allocation2 + $0x110] sm:$0xff] }
 0x751   : > { %v6039_v42 = vpack.c.bf16 %v3916_v41, %v3915_v7 }
 0x753   : > { %5758 = vmatmul.mubr.msk.f32.vlgmr.msra.gmra.mrb[4].mxu0 %vm246_vm0, %v5729_v36  ;;  %5768 = vmatmul.mubr.msk.f32.vlgmr.msra.gmra.mrb[40].mxu1 %vm246_vm0, %v6582_v8  ;;  %v4197_v8 = vld [vmem:[#allocation2 + $0x178] sm:$0xff] }
 0x754   : > { %5760 = vmatprep.mubr.msk.f32.mxu0 %vm246_vm0, %v3336_v39  ;;  %5770 = vmatprep.mubr.msk.f32.mxu1 %vm246_vm0, %v6587_v9  ;;  %v6051_v9 = vpack.c.bf16 %v4197_v8, %v4196_v45 }
 0x755   : > { %6038 = vmatpush3.bf16.msra.mxu1 %v6035_v5  ;;  %6034 = vmatpush3.bf16.msra.mxu0 %v6031_v38 }
 0x756   : > { %6044 = vmatprep.subr.bf16.mxu1 %v6790_v17  ;;  %6040 = vmatprep.subr.bf16.mxu0 %v6039_v42 }
 0x757   : > { %5761 = vmatmul.mubr.msk.f32.gmra.mrb[6].mxu0 %vm246_vm0, %v5732_v6  ;;  %5771 = vmatmul.mubr.msk.f32.gmra.mrb[42].mxu1 %vm246_vm0, %v6596_v10 }
 0x826   : > { %v5769_v49 = vpop.f32.mrb[40].mxu1 }
 0x827   : > { %v3699_v50 = vpop.f32.mrb[41].mxu1 }
 0x828   : > { %5777 = vmatprep.mubr.msk.f32.mxu0 %vm246_vm0, %v3699_v50  ;;  %5787 = vmatprep.mubr.msk.f32.mxu1 %vm246_vm0, %v3699_v50 }
 0x829   : > { %5778 = vmatmul.mubr.msk.f32.vlgmr.msra.gmra.mrb[0].mxu0 %vm246_vm0, %v5769_v49  ;;  %5788 = vmatmul.mubr.msk.f32.vlgmr.msra.gmra.mrb[8].mxu1 %vm246_vm0, %v5769_v49 }
 0x82a   : > { %v5772_v10 = vpop.f32.mrb[42].mxu1  ;;  %6046 = vmatpush3.bf16.msra.mxu1 %v6790_v17  ;;  %6042 = vmatpush3.bf16.msra.mxu0 %v6039_v42 }
 0x82b   : > { %v3709_v52 = vpop.f32.mrb[43].mxu1  ;;  %6052 = vmatprep.subr.bf16.mxu1 %v6051_v9  ;;  %6048 = vmatprep.subr.bf16.mxu0 %v6047_v51 }
 0x82c   : > { %5780 = vmatprep.mubr.msk.f32.mxu0 %vm246_vm0, %v3709_v52  ;;  %5790 = vmatprep.mubr.msk.f32.mxu1 %vm246_vm0, %v3709_v52 }
 0x82d   : > { %5781 = vmatmul.mubr.msk.f32.gmra.mrb[2].mxu0 %vm246_vm0, %v5772_v10  ;;  %5791 = vmatmul.mubr.msk.f32.gmra.mrb[10].mxu1 %vm246_vm0, %v5772_v10 }
 0x82e   : > { %5797 = vmatprep.mubr.msk.f32.mxu0 %vm246_vm0, %v3699_v50  ;;  %5807 = vmatprep.mubr.msk.f32.mxu1 %vm246_vm0, %v6619_v40  ;;  %v4288_v40 = vld [vmem:[#allocation2 + $0x1a0] sm:$0xff] }
 0x82f   : > { %v6055_v54 = vpack.c.bf16 %v4289_v53, %v4288_v40 }
 0x831   : > { %5798 = vmatmul.mubr.msk.f32.vlgmr.msra.gmra.mrb[4].mxu0 %vm246_vm0, %v5769_v49  ;;  %5808 = vmatmul.mubr.msk.f32.vlgmr.msra.gmra.mrb[44].mxu1 %vm246_vm0, %v6629_v43  ;;  %v4466_v43 = vld [vmem:[#allocation2 + $0x1d8] sm:$0xff] }
 0x832   : > { %5800 = vmatprep.mubr.msk.f32.mxu0 %vm246_vm0, %v3709_v52  ;;  %5810 = vmatprep.mubr.msk.f32.mxu1 %vm246_vm0, %v6634_v44  ;;  %v6063_v44 = vpack.c.bf16 %v4466_v43, %v4465_v55 }
 0x833   : > { %6054 = vmatpush3.bf16.msra.mxu1 %v6051_v9  ;;  %6050 = vmatpush3.bf16.msra.mxu0 %v6047_v51 }
 0x834   : > { %6060 = vmatprep.subr.bf16.mxu1 %v6790_v17  ;;  %6056 = vmatprep.subr.bf16.mxu0 %v6055_v54 }
 0x835   : > { %5801 = vmatmul.mubr.msk.f32.gmra.mrb[6].mxu0 %vm246_vm0, %v5772_v10  ;;  %5811 = vmatmul.mubr.msk.f32.gmra.mrb[46].mxu1 %vm246_vm0, %v6645_v46 }
 0x904   : > { %v5809_v58 = vpop.f32.mrb[44].mxu1 }
 0x905   : > { %v4072_v59 = vpop.f32.mrb[45].mxu1 }
 0x906   : > { %5817 = vmatprep.mubr.msk.f32.mxu0 %vm246_vm0, %v4072_v59  ;;  %5827 = vmatprep.mubr.msk.f32.mxu1 %vm246_vm0, %v4072_v59 }
 0x907   : > { %5818 = vmatmul.mubr.msk.f32.vlgmr.msra.gmra.mrb[0].mxu0 %vm246_vm0, %v5809_v58  ;;  %5828 = vmatmul.mubr.msk.f32.vlgmr.msra.gmra.mrb[8].mxu1 %vm246_vm0, %v5809_v58 }
 0x908   : > { %v5812_v46 = vpop.f32.mrb[46].mxu1  ;;  %6062 = vmatpush3.bf16.msra.mxu1 %v6790_v17  ;;  %6058 = vmatpush3.bf16.msra.mxu0 %v6055_v54 }
 0x909   : > { %v4082_v2 = vpop.f32.mrb[47].mxu1  ;;  %6064 = vmatprep.subr.bf16.mxu0 %v6063_v44  ;;  %6068 = vmatprep.subr.bf16.mxu1 %v6067_v1 }
 0x90a   : > { %5820 = vmatprep.mubr.msk.f32.mxu0 %vm246_vm0, %v4082_v2  ;;  %5830 = vmatprep.mubr.msk.f32.mxu1 %vm246_vm0, %v4082_v2 }
 0x90b   : > { %5821 = vmatmul.mubr.msk.f32.gmra.mrb[2].mxu0 %vm246_vm0, %v5812_v46  ;;  %5831 = vmatmul.mubr.msk.f32.gmra.mrb[10].mxu1 %vm246_vm0, %v5812_v46 }
 0x90c   : > { %5837 = vmatprep.mubr.msk.f32.mxu0 %vm246_vm0, %v4072_v59  ;;  %5847 = vmatprep.mubr.msk.f32.mxu1 %vm246_vm0, %v6663_v60  ;;  %v6071_v60 = vpack.c.bf16 %v4662_v12, %v4661_v11 }
 0x90f   : > { %5838 = vmatmul.mubr.msk.f32.vlgmr.msra.gmra.mrb[4].mxu0 %vm246_vm0, %v5809_v58  ;;  %5848 = vmatmul.mubr.msk.f32.vlgmr.msra.gmra.mrb[48].mxu1 %vm246_vm0, %v6675_v61 }
 0x910   : > { %5840 = vmatprep.mubr.msk.f32.mxu0 %vm246_vm0, %v4082_v2  ;;  %5850 = vmatprep.mubr.msk.f32.mxu1 %vm246_vm0, %v6680_v62 }
 0x911   : > { %6066 = vmatpush3.bf16.msra.mxu0 %v6063_v44  ;;  %6070 = vmatpush3.bf16.msra.mxu1 %v6067_v1 }
 0x912   : > { %6072 = vmatprep.subr.bf16.mxu0 %v6071_v60 }
 0x913   : > { %5841 = vmatmul.mubr.msk.f32.gmra.mrb[6].mxu0 %vm246_vm0, %v5812_v46  ;;  %5851 = vmatmul.mubr.msk.f32.gmra.mrb[50].mxu1 %vm246_vm0, %v6691_v63  ;;  %v4753_v63 = vstv %s4752_s11 }
 0x9e2   : > { %v5849_v13 = vpop.f32.mrb[48].mxu1 }
 0x9e3   : > { %v4445_v14 = vpop.f32.mrb[49].mxu1 }
 0x9e4   : > { %5857 = vmatprep.mubr.msk.f32.mxu0 %vm246_vm0, %v4445_v14  ;;  %5867 = vmatprep.mubr.msk.f32.mxu1 %vm246_vm0, %v4445_v14 }
 0x9e5   : > { %5858 = vmatmul.mubr.msk.f32.vlgmr.msra.gmra.mrb[0].mxu0 %vm246_vm0, %v5849_v13  ;;  %5868 = vmatmul.mubr.msk.f32.vlgmr.msra.gmra.mrb[8].mxu1 %vm246_vm0, %v5849_v13 }
 0x9e6   : > { %v5852_v61 = vpop.f32.mrb[50].mxu1  ;;  %6074 = vmatpush3.bf16.msra.mxu0 %v6071_v60 }
 0x9e7   : > { %v4455_v62 = vpop.f32.mrb[51].mxu1 }
 0x9e8   : > { %5860 = vmatprep.mubr.msk.f32.mxu0 %vm246_vm0, %v4455_v62  ;;  %5870 = vmatprep.mubr.msk.f32.mxu1 %vm246_vm0, %v4455_v62 }
 0x9e9   : > { %5861 = vmatmul.mubr.msk.f32.gmra.mrb[2].mxu0 %vm246_vm0, %v5852_v61  ;;  %5871 = vmatmul.mubr.msk.f32.gmra.mrb[10].mxu1 %vm246_vm0, %v5852_v61 }
 0x9ea   : > { %5877 = vmatprep.mubr.msk.f32.mxu0 %vm246_vm0, %v4445_v14 }
 0x9ed   : > { %5878 = vmatmul.mubr.msk.f32.vlgmr.msra.gmra.mrb[4].mxu0 %vm246_vm0, %v5849_v13 }
 0x9ee   : > { %5880 = vmatprep.mubr.msk.f32.mxu0 %vm246_vm0, %v4455_v62 }
 0x9f1   : > { %5881 = vmatmul.mubr.msk.f32.gmra.mrb[6].mxu0 %vm246_vm0, %v5852_v61 }
 0xab8   : > { %v5859_v3 = vpop.f32.mrb[0].mxu0  ;;  %v5869_v16 = vpop.f32.mrb[8].mxu1 }
 0xab9   : > { %v4755_v17 = vadd.f32 %v5859_v3, %v4753_v63  ;;  %v4766_v18 = vadd.f32 %v5869_v16, %v4764_v15  ;;  %v4545_v19 = vpop.f32.mrb[1].mxu0  ;;  %v4637_v20 = vpop.f32.mrb[9].mxu1 }
 0xaba   : > { %v4754_v21 = vadd.f32 %v4753_v63, %v4545_v19  ;;  %v4765_v22 = vadd.f32 %v4764_v15, %v4637_v20 }
 0xabb   : > { %4760 = vst.msk [vmem:[%s6895_s14 + $0x8] sm:$0xff] %vm4758_vm1, %v4755_v17  ;;  %5104 = vst.msk [vmem:[%s6895_s14 + $0x28] sm:$0xff] %vm4758_vm1, %v4766_v18 }
 0xabc   : > { %4759 = vst.msk [vmem:[%s6895_s14] sm:$0xff] %vm4758_vm1, %v4754_v21  ;;  %5103 = vst.msk [vmem:[%s6895_s14 + $0x20] sm:$0xff] %vm4758_vm1, %v4765_v22  ;;  %v5862_v23 = vpop.f32.mrb[2].mxu0  ;;  %v5872_v24 = vpop.f32.mrb[10].mxu1 }
 0xabd   : > { %v4757_v25 = vadd.f32 %v5862_v23, %v4753_v63  ;;  %v4768_v26 = vadd.f32 %v5872_v24, %v4764_v15  ;;  %v4555_v27 = vpop.f32.mrb[3].mxu0  ;;  %v4647_v28 = vpop.f32.mrb[11].mxu1 }
 0xabe   : > { %v4756_v29 = vadd.f32 %v4753_v63, %v4555_v27  ;;  %v4767_v30 = vadd.f32 %v4764_v15, %v4647_v28 }
 0xabf   : > { %4762 = vst.msk [vmem:[%s6895_s14 + $0x18] sm:$0xff] %vm4758_vm1, %v4757_v25  ;;  %5106 = vst.msk [vmem:[%s6895_s14 + $0x38] sm:$0xff] %vm4758_vm1, %v4768_v26 }
 0xac0   : > { %4761 = vst.msk [vmem:[%s6895_s14 + $0x10] sm:$0xff] %vm4758_vm1, %v4756_v29  ;;  %5105 = vst.msk [vmem:[%s6895_s14 + $0x30] sm:$0xff] %vm4758_vm1, %v4767_v30  ;;  %v5879_v31 = vpop.f32.mrb[4].mxu0 }
 0xac1   : > { %v4777_v32 = vadd.f32 %v5879_v31, %v4775_v0  ;;  %v4729_v33 = vpop.f32.mrb[5].mxu0 }
 0xac2   : > { %v4776_v4 = vadd.f32 %v4775_v0, %v4729_v33 }
 0xac3   : > { %5109 = vst.msk [vmem:[%s6895_s14 + $0x48] sm:$0xff] %vm4758_vm1, %v4777_v32 }
 0xac4   : > { %5108 = vst.msk [vmem:[%s6895_s14 + $0x40] sm:$0xff] %vm4758_vm1, %v4776_v4  ;;  %v5882_v34 = vpop.f32.mrb[6].mxu0 }
 0xac5   : > { %v4779_v35 = vadd.f32 %v5882_v34, %v4775_v0  ;;  %v4739_v36 = vpop.f32.mrb[7].mxu0 }
 0xac6   : > { %v4778_v37 = vadd.f32 %v4775_v0, %v4739_v36 }
 0xac7   : > { %5111 = vst.msk [vmem:[%s6895_s14 + $0x58] sm:$0xff] %vm4758_vm1, %v4779_v35 }
 0xac8   : > { %5110 = vst.msk [vmem:[%s6895_s14 + $0x50] sm:$0xff] %vm4758_vm1, %v4778_v37 }
 0xac9   : > { %6330 = shalt.err (!%p6327_p2)
}
 0xaca   : > { %s6331_s27 = scalar_lea.hbm %s6922_s30, 1536  ;;  %s6335_s9 = scalar_lea.hbm %s6977_s4, 3072 }
 0xacb   : > { %p6332_p3 = scmp.ne.s32.totalorder %s6922_s30, %s6331_s27  ;;  %p6336_p7 = scmp.lt.u32.totalorder %s6922_s30, %s6977_s4 }
 0xacc   : > { %p6337_p8 = scmp.lt.u32.totalorder %s6335_s9, %s6331_s27  ;;  %p6339_p12 = scmp.lt.u32.totalorder %s6331_s27, %s6922_s30 }
 0xacd   : > { %p6333_p4 = pnand %p6332_p3, %p6990_p13 }
 0xace   : > { %p6338_p11 = por %p6337_p8, %p6336_p7 }
 0xacf   : > { %p6334_p0 = pneg %p6333_p4 }
 0xad0   : > { %p6340_p1 = por %p6339_p12, %p6338_p11 }
 0xad2   : > { %p6341_p6 = pnand %p6340_p1, %p6334_p0 }
 0xad4   : > { %6344 = shalt.err (!%p6341_p6)
}
 0xad5   : > { %s6394_s13 = smov 128   ;;  %s6395_s14 = smov 8  }
 0xad6   : > { %6218 = dma.vmem_to_hbm [thread:$0]  (%p6990_p13), %s6924_s22, 1536, %s6922_s30, %s6932_s19, %s6394_s13, %s6394_s13, %s6395_s14  }
 0xad7 PF: > { %p6235_p5 = scmp.ge.s32.totalorder %s6387_s18, 2  ;;  %s4814_s20 = sand.u32 1, %s6375_s15  }
 0xad8   : > { %p6991_p9 = scmp.ne.s32.totalorder %s6982_s26, 0  ;;  %s4815_s23 = scalar_lea.sflag [#allocation4], %s4814_s20 }
 0xada   : > { %p6228_p10 = pnand %p6235_p5, %p6991_p9 }
 0xadc   : > { %6370 = dma.done.wait (!%p6228_p10), %s4815_s23, 1536  }
 0xadd   : > { %6372 = vsyncadd (!%p6228_p10), %s4815_s23, 4294965760  ;;  %p16_p2 = scmp.ge.s32.totalorder %s6446_s21, 4   ;;  %s6992_s15 = smov %s6379_s16 }
 0xade   : > { %s6993_s16 = smov %s6383_s17  ;;  %s6994_s17 = smov %s6457_s24 }
 0xadf   : > { %s6995_s18 = smov %s6446_s21  ;;  %18 = sbr.rel (!%p16_p2) target bundleno = 5 (0x5), region = 123 }
 0xae6   :  { %4820 = vsyncpa [#allocation3], 1 }
 0xae7   :  { %4822 = vsyncpa [#allocation3 + $0x1], 1 }
 0xae8   :  { %4823 = vsyncpa [#allocation4], 1 }
 0xae9   :  { %4825 = vsyncpa [#allocation4 + $0x1], 1 }
 0xaea   :  { %4826 = vsyncpa [#allocation5], 1 }
 0xaeb   :  { %4828 = vsyncpa [#allocation5 + $0x1], 1 }

</bundles_post_ra>
